<compile_context>
chip_gen: v6e
topology: v6e:2x2x1
jax: 0.10.0
libtpu: 0.0.40
codegen_flags: <defaults>
</compile_context>

<pallas_src>
import functools

import jax
import jax.numpy as jnp
from jax.experimental import pallas as pl
from jax.experimental.pallas import tpu as pltpu


def _make_kernel(eps):
    def kernel(x_ref, w1x_ref, w1ms_ref, w2_ref, o_ref):
        x = x_ref[...]                                   # (Nb, C, T) f32
        nb, c, _ = x.shape

        # Global per-(n, c) mean / std over time (reference formula E[(x-mu)^2],
        # avoids the E[x^2]-mu^2 cancellation). Lane reductions -> XLU.
        gm = jnp.mean(x, axis=-1, keepdims=True)         # (Nb, C, 1)
        d = x - gm
        gs = jnp.sqrt(jnp.maximum(jnp.mean(d * d, axis=-1, keepdims=True), eps))

        # Conv1 (+ folded BN1 scale) on the time-varying channels: bf16 MXU
        # batched matmul with f32 accumulation; weights broadcast over the
        # sub-batch so the dot_general output order matches x's layout exactly
        # (no in-kernel transposes).
        xb = x.astype(jnp.bfloat16)
        w1x = jnp.broadcast_to(w1x_ref[...], (nb,) + w1x_ref.shape)   # (Nb, B, C)
        h = jnp.einsum("nbc,nct->nbt", w1x, xb,
                       preferred_element_type=jnp.float32)            # (Nb, B, T)

        # The global-mean / global-std input channels are constant over time, so
        # their conv1 contribution plus the BN1 shift collapses to a per-(n, B)
        # bias. The shift is packed as the last row of w1ms (no separate input).
        gm2 = gm[..., 0]                                  # (Nb, C)
        gs2 = gs[..., 0]                                  # (Nb, C)
        w1m = w1ms_ref[:c, :]                             # (C, B)
        w1s = w1ms_ref[c:2 * c, :]                        # (C, B)
        b1 = w1ms_ref[2 * c:, :]                          # (1, B)  folded BN1 shift
        bias = (jnp.dot(gm2, w1m, preferred_element_type=jnp.float32)
                + jnp.dot(gs2, w1s, preferred_element_type=jnp.float32)
                + b1)                                     # (Nb, B)  (kept f32)
        h = jnp.tanh(h + bias[:, :, None])                # (Nb, B, T)

        # Conv2 (+ folded BN2 scale), bf16 MXU. The BN2 shift is constant over
        # time per channel, so it cancels in the softmax and is dropped.
        w2 = jnp.broadcast_to(w2_ref[...], (nb,) + w2_ref.shape)      # (Nb, C, B)
        a = jnp.einsum("ncb,nbt->nct", w2, h.astype(jnp.bfloat16),
                       preferred_element_type=jnp.float32)            # (Nb, C, T)

        # Per-(n, c) softmax over T with a true per-segment max: denominator
        # z >= 1, so no underflow / no clamping needed.  Normalisation is
        # deferred to the (Nb, C)-sized moments.
        p = jnp.exp(a - jnp.max(a, axis=-1, keepdims=True))           # (Nb, C, T)
        z = jnp.sum(p, axis=-1)                                        # (Nb, C)
        px = p * x
        sx = jnp.sum(px, axis=-1)                                      # (Nb, C)
        sx2 = jnp.sum(px * x, axis=-1)                                 # (Nb, C)

        inv_z = pl.reciprocal(z)           # exact; approx gains nothing at (Nb, C)
        mean = sx * inv_z
        std = jnp.sqrt(jnp.maximum(sx2 * inv_z - mean * mean, eps))

        # Lane-dense (Nb, 2C) output tile; write the halves as slice stores.
        o_ref[:, :c] = mean
        o_ref[:, c:] = std

    return kernel


def _pick_block_batch(n):
    """Default sub-batch per grid step.

    Two even grid steps let the "parallel" axis shard across v7x's two
    TensorCores; on single-TC v5e/v6e the extra step costs only ~0.35 us.
    """
    if n % 2 == 0:
        return n // 2
    return n


@functools.partial(jax.jit, static_argnames=("eps", "bn_eps", "block_batch"))
def ecapa_attention_pooling(x, params, eps=1e-4, bn_eps=1e-5, block_batch=None):
    """x: (N, C, T) float32.  Returns (N, 2*C) = concat([mean, std], axis=1)."""
    n, c, t = x.shape
    w1 = params["w1"]                       # (B, 3C) Conv1d(3C -> B, k=1), k squeezed
    w2 = params["w2"]                       # (C, B)  Conv1d(B -> C, k=1)
    bk = w1.shape[0]

    nb = block_batch if block_batch is not None else _pick_block_batch(n)
    assert n % nb == 0, (n, nb)
    num_blocks = n // nb

    # Fold eval-mode BatchNorm into the conv weights (one-time, outside the kernel).
    s1 = params["bn1_gamma"] * jax.lax.rsqrt(params["bn1_var"] + bn_eps)     # (B,)
    b1 = params["bn1_beta"] - params["bn1_mean"] * s1                        # (B,)
    s2 = params["bn2_gamma"] * jax.lax.rsqrt(params["bn2_var"] + bn_eps)     # (C,)
    # BN2 shift is constant per channel over time -> cancels in softmax -> dropped.

    # bf16 weights for the MXU conv matmuls (accumulation stays f32 in-kernel).
    w1x = (w1[:, :c] * s1[:, None]).astype(jnp.bfloat16)                     # (B, C)
    w2s = (w2 * s2[:, None]).astype(jnp.bfloat16)                            # (C, B)
    # Mean/std-channel weights + folded BN1 shift, pre-transposed to (2C+1, B),
    # kept f32 (tiny bias matmul; precision matters more than speed here).
    w1ms = jnp.concatenate([w1[:, c:] * s1[:, None], b1[:, None]], axis=1).T

    out = pl.pallas_call(
        _make_kernel(eps),
        out_shape=jax.ShapeDtypeStruct((n, 2 * c), jnp.float32),
        grid_spec=pltpu.PrefetchScalarGridSpec(
            num_scalar_prefetch=0,
            grid=(num_blocks,),
            in_specs=[
                pl.BlockSpec((nb, c, t), lambda g: (g, 0, 0)),       # x (streamed)
                pl.BlockSpec((bk, c), lambda g: (0, 0)),             # conv1 x-weights
                pl.BlockSpec((2 * c + 1, bk), lambda g: (0, 0)),     # [mean|std|shift] weights
                pl.BlockSpec((c, bk), lambda g: (0, 0)),             # conv2 weights
            ],
            out_specs=pl.BlockSpec((nb, 2 * c), lambda g: (g, 0)),   # lane-dense output
        ),
        compiler_params=pltpu.CompilerParams(
            dimension_semantics=("parallel",),
            vmem_limit_bytes=64 * 1024 * 1024),
    )(x, w1x, w1ms, w2s)
    return out


def reference(x, params, eps=1e-4, bn_eps=1e-5):
    """Pure-JAX mirror of the PyTorch forward (eval-mode BatchNorm)."""
    gm = jnp.mean(x, axis=2, keepdims=True)
    gs = jnp.sqrt(jnp.maximum(jnp.mean((x - gm) ** 2, axis=2, keepdims=True), eps))
    gx = jnp.concatenate(
        [x, jnp.broadcast_to(gm, x.shape), jnp.broadcast_to(gs, x.shape)], axis=1)

    def bn(h, g, b, rm, rv):
        return (h - rm[None, :, None]) / jnp.sqrt(rv[None, :, None] + bn_eps) \
               * g[None, :, None] + b[None, :, None]

    h = jnp.einsum("bk,nkt->nbt", params["w1"], gx)
    h = jnp.tanh(bn(h, params["bn1_gamma"], params["bn1_beta"],
                    params["bn1_mean"], params["bn1_var"]))
    a = jnp.einsum("cb,nbt->nct", params["w2"], h)
    a = bn(a, params["bn2_gamma"], params["bn2_beta"],
           params["bn2_mean"], params["bn2_var"])
    w = jax.nn.softmax(a, axis=2)
    mean = jnp.sum(w * x, axis=2)
    std = jnp.sqrt(jnp.maximum(jnp.sum(x ** 2 * w, axis=2) - mean ** 2, eps))
    return jnp.concatenate([mean, std], axis=1)


def init_params(key, in_channels, bottleneck_channels):
    ks = jax.random.split(key, 10)
    c, b = in_channels, bottleneck_channels
    return {
        "w1": 0.1 * jax.random.normal(ks[0], (b, 3 * c), jnp.float32),
        "w2": 0.1 * jax.random.normal(ks[1], (c, b), jnp.float32),
        "bn1_gamma": 1.0 + 0.1 * jax.random.normal(ks[2], (b,), jnp.float32),
        "bn1_beta": 0.1 * jax.random.normal(ks[3], (b,), jnp.float32),
        "bn1_mean": 0.05 * jax.random.normal(ks[4], (b,), jnp.float32),
        "bn1_var": jax.random.uniform(ks[5], (b,), jnp.float32, 0.5, 1.5),
        "bn2_gamma": 1.0 + 0.1 * jax.random.normal(ks[6], (c,), jnp.float32),
        "bn2_beta": 0.1 * jax.random.normal(ks[7], (c,), jnp.float32),
        "bn2_mean": 0.05 * jax.random.normal(ks[8], (c,), jnp.float32),
        "bn2_var": jax.random.uniform(ks[9], (c,), jnp.float32, 0.5, 1.5),
    }


if __name__ == "__main__":
    # Small shapes: batch=16, in_channels=16, bottleneck=8, time=32.
    # -> Nb=8 batch elements per grid step, grid length 2 (both v7x TCs active).
    n, c, bk, t = 16, 16, 8, 32
    key = jax.random.PRNGKey(0)
    kx, kp = jax.random.split(key)
    x = jax.random.normal(kx, (n, c, t), jnp.float32)
    params = init_params(kp, c, bk)

    out = jax.block_until_ready(ecapa_attention_pooling(x, params))
    ref = reference(x, params)

    assert out.shape == (n, 2 * c), out.shape
    # bf16 MXU operands on the conv matmuls give ~1e-3-level agreement with the
    # all-f32 reference (moment math stays f32); 5e-3 leaves comfortable margin.
    err = float(jnp.max(jnp.abs(out - ref)))
    assert jnp.allclose(out, ref, atol=5e-3, rtol=5e-3), err
    print("KERNEL_OK")
</pallas_src>

<mosaic_0001>
module attributes {stable_mosaic.version = 11 : i64} {
  func.func @kernel(%arg0: i32, %arg1: memref<8x16x32xf32, #tpu.memory_space<vmem>>, %arg2: memref<8x16xbf16, #tpu.memory_space<vmem>>, %arg3: memref<33x8xf32, #tpu.memory_space<vmem>>, %arg4: memref<16x8xbf16, #tpu.memory_space<vmem>>, %arg5: memref<8x32xf32, #tpu.memory_space<vmem>>) attributes {dimension_semantics = [#tpu.dimension_semantics<parallel>], iteration_bounds = array<i64: 2>, scalar_prefetch = 0 : i64, scratch_operands = 0 : i64, tpu.core_type = #tpu.core_type<tc>, window_params = [{transform_indices = @transform_0, window_bounds = array<i64: 8, 16, 32>}, {pipeline_mode = #tpu.pipeline_mode<synchronous>, transform_indices = @transform_1, window_bounds = array<i64: 8, 16>}, {pipeline_mode = #tpu.pipeline_mode<synchronous>, transform_indices = @transform_2, window_bounds = array<i64: 33, 8>}, {pipeline_mode = #tpu.pipeline_mode<synchronous>, transform_indices = @transform_3, window_bounds = array<i64: 16, 8>}, {transform_indices = @transform_4, window_bounds = array<i64: 8, 32>}]} {
    %c0 = arith.constant 0 : index
    %c0_0 = arith.constant 0 : index
    %c0_1 = arith.constant 0 : index
    %0 = vector.load %arg1[%c0, %c0_0, %c0_1] : memref<8x16x32xf32, #tpu.memory_space<vmem>>, vector<8x16x32xf32>
    %cst = arith.constant dense<0.000000e+00> : vector<8x16xf32>
    %1 = vector.multi_reduction <add>, %0, %cst [2] : vector<8x16x32xf32> to vector<8x16xf32>
    %2 = vector.shape_cast %1 : vector<8x16xf32> to vector<8x16x1xf32>
    %cst_2 = arith.constant 3.200000e+01 : f32
    %3 = vector.broadcast %cst_2 : f32 to vector<8x16x1xf32>
    %4 = arith.divf %2, %3 : vector<8x16x1xf32>
    %5 = vector.broadcast %4 : vector<8x16x1xf32> to vector<8x16x32xf32>
    %6 = arith.subf %0, %5 : vector<8x16x32xf32>
    %7 = arith.mulf %6, %6 : vector<8x16x32xf32>
    %cst_3 = arith.constant dense<0.000000e+00> : vector<8x16xf32>
    %8 = vector.multi_reduction <add>, %7, %cst_3 [2] : vector<8x16x32xf32> to vector<8x16xf32>
    %9 = vector.shape_cast %8 : vector<8x16xf32> to vector<8x16x1xf32>
    %cst_4 = arith.constant 3.200000e+01 : f32
    %10 = vector.broadcast %cst_4 : f32 to vector<8x16x1xf32>
    %11 = arith.divf %9, %10 : vector<8x16x1xf32>
    %cst_5 = arith.constant 9.99999974E-5 : f32
    %12 = vector.broadcast %cst_5 : f32 to vector<8x16x1xf32>
    %13 = arith.maximumf %11, %12 : vector<8x16x1xf32>
    %14 = math.sqrt %13 : vector<8x16x1xf32>
    %15 = arith.truncf %0 : vector<8x16x32xf32> to vector<8x16x32xbf16>
    %c0_6 = arith.constant 0 : index
    %c0_7 = arith.constant 0 : index
    %16 = vector.load %arg2[%c0_6, %c0_7] : memref<8x16xbf16, #tpu.memory_space<vmem>>, vector<8x16xbf16>
    %17 = vector.shape_cast %16 : vector<8x16xbf16> to vector<1x8x16xbf16>
    %18 = vector.broadcast %17 : vector<1x8x16xbf16> to vector<8x8x16xbf16>
    "tpu.trace_start"() <{level = 10 : i32, message = "nbc,nct->nbt"}> : () -> ()
    %cst_8 = arith.constant dense<0.000000e+00> : vector<8x8x32xf32>
    %19 = tpu.matmul %18, %15, %cst_8 {dimension_numbers = #tpu.dot_dimension_numbers<[2], [1], [1], [2], [0, 0, 0, 1, 1, 2], [0], [0]>} : vector<8x8x16xbf16>, vector<8x16x32xbf16>, vector<8x8x32xf32> -> vector<8x8x32xf32>
    "tpu.trace_stop"() : () -> ()
    %20 = vector.shape_cast %4 : vector<8x16x1xf32> to vector<8x16xf32>
    %21 = vector.shape_cast %14 : vector<8x16x1xf32> to vector<8x16xf32>
    %c0_9 = arith.constant 0 : index
    %c0_10 = arith.constant 0 : index
    %22 = vector.load %arg3[%c0_9, %c0_10] : memref<33x8xf32, #tpu.memory_space<vmem>>, vector<16x8xf32>
    %c16 = arith.constant 16 : index
    %c0_11 = arith.constant 0 : index
    %23 = vector.load %arg3[%c16, %c0_11] : memref<33x8xf32, #tpu.memory_space<vmem>>, vector<16x8xf32>
    %c32 = arith.constant 32 : index
    %c0_12 = arith.constant 0 : index
    %24 = vector.load %arg3[%c32, %c0_12] : memref<33x8xf32, #tpu.memory_space<vmem>>, vector<1x8xf32>
    %cst_13 = arith.constant dense<0.000000e+00> : vector<8x8xf32>
    %25 = tpu.matmul %20, %22, %cst_13 {dimension_numbers = #tpu.dot_dimension_numbers<[1], [0], [0], [1], [0, 0, 1, 1], [], []>} : vector<8x16xf32>, vector<16x8xf32>, vector<8x8xf32> -> vector<8x8xf32>
    %cst_14 = arith.constant dense<0.000000e+00> : vector<8x8xf32>
    %26 = tpu.matmul %21, %23, %cst_14 {dimension_numbers = #tpu.dot_dimension_numbers<[1], [0], [0], [1], [0, 0, 1, 1], [], []>} : vector<8x16xf32>, vector<16x8xf32>, vector<8x8xf32> -> vector<8x8xf32>
    %27 = arith.addf %25, %26 : vector<8x8xf32>
    %28 = vector.broadcast %24 : vector<1x8xf32> to vector<8x8xf32>
    %29 = arith.addf %27, %28 : vector<8x8xf32>
    %30 = vector.shape_cast %29 : vector<8x8xf32> to vector<8x8x1xf32>
    %31 = vector.broadcast %30 : vector<8x8x1xf32> to vector<8x8x32xf32>
    %32 = arith.addf %19, %31 : vector<8x8x32xf32>
    %33 = math.tanh %32 : vector<8x8x32xf32>
    %c0_15 = arith.constant 0 : index
    %c0_16 = arith.constant 0 : index
    %34 = vector.load %arg4[%c0_15, %c0_16] : memref<16x8xbf16, #tpu.memory_space<vmem>>, vector<16x8xbf16>
    %35 = vector.shape_cast %34 : vector<16x8xbf16> to vector<1x16x8xbf16>
    %36 = vector.broadcast %35 : vector<1x16x8xbf16> to vector<8x16x8xbf16>
    %37 = arith.truncf %33 : vector<8x8x32xf32> to vector<8x8x32xbf16>
    "tpu.trace_start"() <{level = 10 : i32, message = "ncb,nbt->nct"}> : () -> ()
    %cst_17 = arith.constant dense<0.000000e+00> : vector<8x16x32xf32>
    %38 = tpu.matmul %36, %37, %cst_17 {dimension_numbers = #tpu.dot_dimension_numbers<[2], [1], [1], [2], [0, 0, 0, 1, 1, 2], [0], [0]>} : vector<8x16x8xbf16>, vector<8x8x32xbf16>, vector<8x16x32xf32> -> vector<8x16x32xf32>
    "tpu.trace_stop"() : () -> ()
    %cst_18 = arith.constant dense<0xFF800000> : vector<8x16xf32>
    %39 = vector.multi_reduction <maximumf>, %38, %cst_18 [2] : vector<8x16x32xf32> to vector<8x16xf32>
    %40 = vector.shape_cast %39 : vector<8x16xf32> to vector<8x16x1xf32>
    %41 = vector.broadcast %40 : vector<8x16x1xf32> to vector<8x16x32xf32>
    %42 = arith.subf %38, %41 : vector<8x16x32xf32>
    %43 = math.exp %42 : vector<8x16x32xf32>
    %cst_19 = arith.constant dense<0.000000e+00> : vector<8x16xf32>
    %44 = vector.multi_reduction <add>, %43, %cst_19 [2] : vector<8x16x32xf32> to vector<8x16xf32>
    %45 = arith.mulf %43, %0 : vector<8x16x32xf32>
    %cst_20 = arith.constant dense<0.000000e+00> : vector<8x16xf32>
    %46 = vector.multi_reduction <add>, %45, %cst_20 [2] : vector<8x16x32xf32> to vector<8x16xf32>
    %47 = arith.mulf %45, %0 : vector<8x16x32xf32>
    %cst_21 = arith.constant dense<0.000000e+00> : vector<8x16xf32>
    %48 = vector.multi_reduction <add>, %47, %cst_21 [2] : vector<8x16x32xf32> to vector<8x16xf32>
    %49 = tpu.reciprocal %44 : vector<8x16xf32> -> vector<8x16xf32>
    %50 = arith.mulf %46, %49 : vector<8x16xf32>
    %51 = arith.mulf %48, %49 : vector<8x16xf32>
    %52 = arith.mulf %50, %50 : vector<8x16xf32>
    %53 = arith.subf %51, %52 : vector<8x16xf32>
    %cst_22 = arith.constant 9.99999974E-5 : f32
    %54 = vector.broadcast %cst_22 : f32 to vector<8x16xf32>
    %55 = arith.maximumf %53, %54 : vector<8x16xf32>
    %56 = math.sqrt %55 : vector<8x16xf32>
    %c0_23 = arith.constant 0 : index
    %c0_24 = arith.constant 0 : index
    %57 = vector.load %arg5[%c0_23, %c0_24] : memref<8x32xf32, #tpu.memory_space<vmem>>, vector<8x16xf32>
    tpu.vector_store %arg5[%c0_23, %c0_24], %50 {strides = array<i32>} : memref<8x32xf32, #tpu.memory_space<vmem>>, vector<8x16xf32>,
    %c0_25 = arith.constant 0 : index
    %c16_26 = arith.constant 16 : index
    %58 = vector.load %arg5[%c0_25, %c16_26] : memref<8x32xf32, #tpu.memory_space<vmem>>, vector<8x16xf32>
    tpu.vector_store %arg5[%c0_25, %c16_26], %56 {strides = array<i32>} : memref<8x32xf32, #tpu.memory_space<vmem>>, vector<8x16xf32>,
    return
  }
  func.func @transform_0(%arg0: i32) -> (i32, i32, i32) {
    %c0_i32 = arith.constant 0 : i32
    %c0_i32_0 = arith.constant 0 : i32
    %c0_i32_1 = arith.constant 0 : i32
    return %arg0, %c0_i32, %c0_i32_0 : i32, i32, i32
  }
  func.func @transform_1(%arg0: i32) -> (i32, i32) {
    %c0_i32 = arith.constant 0 : i32
    %c0_i32_0 = arith.constant 0 : i32
    %c0_i32_1 = arith.constant 0 : i32
    return %c0_i32, %c0_i32_0 : i32, i32
  }
  func.func @transform_2(%arg0: i32) -> (i32, i32) {
    %c0_i32 = arith.constant 0 : i32
    %c0_i32_0 = arith.constant 0 : i32
    %c0_i32_1 = arith.constant 0 : i32
    return %c0_i32, %c0_i32_0 : i32, i32
  }
  func.func @transform_3(%arg0: i32) -> (i32, i32) {
    %c0_i32 = arith.constant 0 : i32
    %c0_i32_0 = arith.constant 0 : i32
    %c0_i32_1 = arith.constant 0 : i32
    return %c0_i32, %c0_i32_0 : i32, i32
  }
  func.func @transform_4(%arg0: i32) -> (i32, i32) {
    %c0_i32 = arith.constant 0 : i32
    %c0_i32_0 = arith.constant 0 : i32
    return %arg0, %c0_i32 : i32, i32
  }
}

</mosaic_0001>

<bundles_post_ra>
// kernel: ecapa_attention_pooling.1
= control target key start
LH: loop header
LB: loop body
LE: loop exit
PB: predicated region body
PF: predicated region fallthrough
CT: control target
= control target key end

     0   :  { %9 = vsyncpa [#allocation3], 0  ;;  %s3897_s0 = inlined_call_operand.vmem [shape: f32[16,16,32], index: 0, kind: input, shape index: {}]   ;;  %s3898_s1 = inlined_call_operand.vmem [shape: bf16[8,16], index: 1, kind: input, shape index: {}]   ;;  %s3899_s2 = inlined_call_operand.vmem [shape: f32[33,8], index: 2, kind: input, shape index: {}]   ;;  %s3900_s3 = inlined_call_operand.vmem [shape: bf16[16,8], index: 3, kind: input, shape index: {}]   ;;  %s3901_s4 = inlined_call_operand.hbm [shape: f32[16,32], index: 4, kind: output, shape index: {}]  }
   0x1   :  { %11 = vsyncpa [#allocation3 + $0x1], 0  ;;  %s2856_s15 = smov 0   ;;  %s2858_s16 = smov 0  }
   0x2   :  { %s2860_s17 = smov 0   ;;  %s2862_s18 = smov 0  }
   0x3 LB: > { %s2877_s19 = sadd.s32 4294967295, %s2826_s18   ;;  %s2383_s20 = sadd.s32 4294967294, %s2826_s18   ;;  %s2826_s18 = sphi %s2862_s18, %s4002_s18   ;;  %s2822_s17 = sphi %s2860_s17, %s4001_s17   ;;  %s2818_s16 = sphi %s2858_s16, %s4000_s16   ;;  %s2814_s15 = sphi %s2856_s15, %s3999_s15  }
   0x4   : > { %s2881_s21 = sadd.s32 1, %s2826_s18   ;;  %s113_s22 = sadd.s32 1, %s2822_s17 }
   0x5   : > { %s110_s23 = ssub.s32 %s2826_s18, %s2881_s21  ;;  %p123_p0 = scmp.ne.s32.totalorder %s2822_s17, %s2818_s16 }
   0x6   : > { %p111_p1 = scmp.eq.s32.totalorder %s110_s23, 0  ;;  %p124_p2 = scmp.eq.s32.totalorder %s2877_s19, 1 }
   0x7   : > { %p129_p3 = scmp.ne.s32.totalorder %s2818_s16, %s2814_s15  ;;  %p130_p4 = scmp.eq.s32.totalorder %s2383_s20, 1 }
   0x8   : > { %s2892_s24 = scalar_select %p111_p1, %s2822_s17, %s113_s22  }
   0x9   : > { %p2894_p5 = por %p124_p2, %p123_p0  ;;  %p2898_p6 = por %p130_p4, %p129_p3 }
   0xa   : > { %p2386_p7 = scmp.ge.s32.totalorder %s2826_s18, 1  ;;  %p167_p8 = scmp.lt.s32.totalorder %s2826_s18, 3 }
   0xc   : > { %p168_p9 = pnand %p2386_p7, %p167_p8 }
   0xd   : > { %s2388_s27 = sshll.u32 (!%p168_p9), %s2877_s19, 3  ;;  %s191_s29 = sand.u32 (!%p168_p9), 1, %s2818_s16  }
   0xe   : > { %171 = sbr.rel (%p168_p9) target bundleno = 1329 (0x531), region = 36  ;;  %p195_p10 = scmp.lt.s32.totalorder (!%p168_p9), %s2388_s27, 15 }
   0xf   : > { %s2387_s30 = sshll.u32 (!%p168_p9), %s191_s29, 3  ;;  %s2412_s6 = sshll.u32 (!%p168_p9), %s2877_s19, 7 }
  0x10   : > { %s3858_s19 = scalar_lea.hbm (!%p168_p9), %s3901_s4, %s2412_s6  ;;  %s2311_s10 = scalar_lea.sflag (!%p168_p9), [#allocation3], %s191_s29 }
  0x11   : > { %s2830_s12 = smov (!%p168_p9), [#allocation2]  }
  0x12   : > { %s2770_s13 = sshll.u32 (!%p168_p9), %s2830_s12, 4  ;;  %s2771_s13 = int_to_ptr.vmem [resolvable:$false] %s2770_s13 }
  0x13   : > { %s4004_s27 = smov (!%p195_p10, %s2388_s27), 15  ;;  %vm3902_vm0 = vcmask 261120   ;;  %v518_v32 = vld [vmem:[%s3899_s2 + $0x8] sm:$0xff]  ;;  %v2828_v33 = vmov 0.0   ;;  %v517_v34 = vld [vmem:[%s3899_s2] sm:$0xff]  ;;  %vm3903_vm1 = vmmov 0   ;;  %v538_v39 = vlaneseq }
  0x14   : > { %s2415_s28 = sshll.u32 %s4004_s27, 4  ;;  %2461 = vmatprep.subr.mxu1 %v2828_v33  ;;  %2454 = vmatprep.subr.mxu0 %v2828_v33  ;;  %vm549_vm2 = vcmask 130112   ;;  %vm614_vm3 = vcmask 1041409   ;;  %vm3911_vm4 = vcmask 1042434   ;;  %vm3910_vm5 = vcmask 1043459   ;;  %s2772_s14 = scalar_lea.vmem %s2771_s13, 256 }
  0x15   : > { %s2908_s5 = scalar_lea.vmem %s3897_s0, %s2415_s28  ;;  %2462 = vmatpush3.msra.mxu1 %v518_v32  ;;  %2465 = vmatprep.mubr.msk.f32.mxu1 %vm3903_vm1, %v2828_v33  ;;  %v3014_v47 = vand.u32 127, %v538_v39  ;;  %v3024_v58 = vshrl.u32 %v538_v39, 7  ;;  %vm3909_vm6 = vcmask 1044484   ;;  %vm3908_vm7 = vcmask 1045509  }
  0x16   : > { %v2911_v0 = vld [vmem:[%s2908_s5 + $0x10] sm:$0xff]  ;;  %v2914_v1 = vld [vmem:[%s2908_s5] sm:$0xff]  ;;  %v2917_v2 = vld [vmem:[%s2908_s5 + $0x18] sm:$0xff]  ;;  %2463 = vmatprep.subr.mxu1 %v2828_v33  ;;  %2458 = vmatprep.mubr.msk.f32.mxu0 %vm3903_vm1, %v2828_v33  ;;  %vm3907_vm8 = vcmask 1046534   ;;  %vm3906_vm9 = vcmask 1047559   ;;  %vm3905_vm10 = vcmask 130048  }
  0x17   : > { %v225_v3 = vsel %vm3902_vm0, %v2911_v0, 0.0  ;;  %v219_v4 = vsel %vm3902_vm0, %v2914_v1, 0.0  ;;  %v2924_v5 = vld [vmem:[%s2908_s5 + $0x8] sm:$0xff]  ;;  %v228_v6 = vsel %vm3902_vm0, %v2917_v2, 0.0  ;;  %v2934_v9 = vld [vmem:[%s2908_s5 + $0x20] sm:$0xff]  ;;  %v2941_v12 = vld [vmem:[%s2908_s5 + $0x38] sm:$0xff]  ;;  %2464 = vmatpush3.msra.mxu1 %v517_v34 }
  0x18   : > { %226 = vadd.xlane.f32.xlu1 %v225_v3  ;;  %220 = vadd.xlane.f32.xlu0 %v219_v4  ;;  %v222_v7 = vsel %vm3902_vm0, %v2924_v5, 0.0  ;;  %v2931_v8 = vld [vmem:[%s2908_s5 + $0x28] sm:$0xff]  ;;  %v231_v11 = vsel %vm3902_vm0, %v2934_v9, 0.0  ;;  %v2944_v13 = vld [vmem:[%s2908_s5 + $0x30] sm:$0xff]  ;;  %v240_v14 = vsel %vm3902_vm0, %v2941_v12, 0.0  ;;  %v2954_v17 = vld [vmem:[%s2908_s5 + $0x40] sm:$0xff] }
  0x19   : > { %v234_v10 = vsel %vm3902_vm0, %v2931_v8, 0.0  ;;  %v237_v15 = vsel %vm3902_vm0, %v2944_v13, 0.0  ;;  %v2951_v16 = vld [vmem:[%s2908_s5 + $0x48] sm:$0xff]  ;;  %v243_v19 = vsel %vm3902_vm0, %v2954_v17, 0.0  ;;  %v2961_v20 = vld [vmem:[%s2908_s5 + $0x58] sm:$0xff]  ;;  %v2964_v21 = vld [vmem:[%s2908_s5 + $0x50] sm:$0xff]  ;;  %2474 = vmatprep.subr.bf16.mxu1 %v2828_v33 }
  0x1a   : > { %v246_v18 = vsel %vm3902_vm0, %v2951_v16, 0.0  ;;  %v252_v22 = vsel %vm3902_vm0, %v2961_v20, 0.0  ;;  %v249_v23 = vsel %vm3902_vm0, %v2964_v21, 0.0  ;;  %v2971_v24 = vld [vmem:[%s2908_s5 + $0x68] sm:$0xff]  ;;  %v2974_v25 = vld [vmem:[%s2908_s5 + $0x60] sm:$0xff]  ;;  %v2981_v28 = vld [vmem:[%s2908_s5 + $0x78] sm:$0xff] }
  0x1b   : > { %v258_v26 = vsel %vm3902_vm0, %v2971_v24, 0.0  ;;  %v255_v27 = vsel %vm3902_vm0, %v2974_v25, 0.0  ;;  %v2984_v29 = vld [vmem:[%s2908_s5 + $0x70] sm:$0xff]  ;;  %v264_v30 = vsel %vm3902_vm0, %v2981_v28, 0.0  ;;  %v544_v50 = vadd.s32 4294967288, %v3014_v47 }
  0x1c   : > { %229 = vadd.xlane.f32.xlu1 %v228_v6  ;;  %223 = vadd.xlane.f32.xlu0 %v222_v7  ;;  %v261_v31 = vsel %vm3902_vm0, %v2984_v29, 0.0 }
  0x1d   : > { %v3030_v63 = vsub.s32 %v544_v50, %v3024_v58 }
  0x20   : > { %235 = vadd.xlane.f32.xlu1 %v234_v10  ;;  %232 = vadd.xlane.f32.xlu0 %v231_v11 }
  0x24   : > { %241 = vadd.xlane.f32.xlu1 %v240_v14  ;;  %238 = vadd.xlane.f32.xlu0 %v237_v15  ;;  %v3035_v14 = vsub.s32 %v3014_v47, %v3024_v58 }
  0x28   : > { %247 = vadd.xlane.f32.xlu1 %v246_v18  ;;  %244 = vadd.xlane.f32.xlu0 %v243_v19 }
  0x2c   : > { %253 = vadd.xlane.f32.xlu1 %v252_v22  ;;  %250 = vadd.xlane.f32.xlu0 %v249_v23 }
  0x30   : > { %259 = vadd.xlane.f32.xlu1 %v258_v26  ;;  %256 = vadd.xlane.f32.xlu0 %v255_v27 }
  0x34   : > { %265 = vadd.xlane.f32.xlu1 %v264_v30  ;;  %262 = vadd.xlane.f32.xlu0 %v261_v31 }
  0xa1   : > { %v227_v35 = vpop.xlane.xlu1 %226  ;;  %v221_v36 = vpop.xlane.xlu0 %220 }
  0xa2   : > { %v3004_v37 = vmul.f32 0.03125, %v227_v35  ;;  %v3006_v38 = vmul.f32 0.03125, %v221_v36 }
  0xa4   : > { %v284_v40 = vsub.f32 %v2914_v1, %v3006_v38  ;;  %v286_v41 = vsub.f32 %v2911_v0, %v3004_v37  ;;  %v729_v23 = vrot.slane %v3004_v37, %v3035_v14  ;;  %v720_v39 = vrot.slane %v3006_v38, %v3035_v14 }
  0xa5   : > { %v230_v42 = vpop.xlane.xlu1 %229  ;;  %v224_v43 = vpop.xlane.xlu0 %223 }
  0xa6   : > { %v3012_v44 = vmul.f32 0.03125, %v224_v43  ;;  %v300_v45 = vmul.f32 %v284_v40, %v284_v40  ;;  %v302_v46 = vmul.f32 %v286_v41, %v286_v41  ;;  %v271_v48 = vmul.f32 0.03125, %v230_v42 }
  0xa8   : > { %v316_v49 = vsel %vm3902_vm0, %v300_v45, 0.0  ;;  %v285_v53 = vsub.f32 %v2924_v5, %v3012_v44  ;;  %v287_v54 = vsub.f32 %v2917_v2, %v271_v48  ;;  %v322_v57 = vsel %vm3902_vm0, %v302_v46, 0.0 }
  0xa9   : > { %v236_v51 = vpop.xlane.xlu1 %235  ;;  %317 = vadd.xlane.f32.xlu0 %v316_v49  ;;  %v233_v52 = vpop.xlane.xlu0 %232  ;;  %v733_v26 = vrot.slane %v271_v48, %v3030_v63  ;;  %v724_v32 = vrot.slane %v3012_v44, %v3030_v63 }
  0xaa   : > { %v3021_v55 = vmul.f32 0.03125, %v236_v51  ;;  %v272_v56 = vmul.f32 0.03125, %v233_v52  ;;  %v301_v59 = vmul.f32 %v285_v53, %v285_v53  ;;  %v303_v60 = vmul.f32 %v287_v54, %v287_v54 }
  0xab   : > { %v734_v45 = vsel %vm549_vm2, %v733_v26, %v729_v23  ;;  %v725_v51 = vsel %vm549_vm2, %v724_v32, %v720_v39 }
  0xac   : > { %v288_v61 = vsub.f32 %v2934_v9, %v272_v56  ;;  %v289_v62 = vsub.f32 %v2931_v8, %v3021_v55  ;;  %v319_v4 = vsel %vm3902_vm0, %v301_v59, 0.0  ;;  %v325_v15 = vsel %vm3902_vm0, %v303_v60, 0.0 }
  0xad   : > { %v242_v3 = vpop.xlane.xlu1 %241  ;;  %323 = vadd.xlane.f32.xlu0 %v322_v57  ;;  %v239_v6 = vpop.xlane.xlu0 %238  ;;  %320 = vadd.xlane.f32.xlu1 %v319_v4  ;;  %v742_v41 = vrot.slane %v3021_v55, %v3030_v63  ;;  %v738_v42 = vrot.slane %v272_v56, %v3035_v14 }
  0xae   : > { %v275_v7 = vmul.f32 0.03125, %v242_v3  ;;  %v274_v10 = vmul.f32 0.03125, %v239_v6  ;;  %v304_v11 = vmul.f32 %v288_v61, %v288_v61  ;;  %v305_v18 = vmul.f32 %v289_v62, %v289_v62 }
  0xaf   : > { %v743_v60 = vsel %vm549_vm2, %v742_v41, %v738_v42  ;;  %v789_v3 = vsel %vm614_vm3, %v734_v45, %v725_v51 }
  0xb0   : > { %v291_v19 = vsub.f32 %v2941_v12, %v275_v7  ;;  %v290_v22 = vsub.f32 %v2944_v13, %v274_v10  ;;  %v328_v30 = vsel %vm3902_vm0, %v304_v11, 0.0  ;;  %v331_v37 = vsel %vm3902_vm0, %v305_v18, 0.0 }
  0xb1   : > { %v248_v27 = vpop.xlane.xlu1 %247  ;;  %v245_v31 = vpop.xlane.xlu0 %244  ;;  %326 = vadd.xlane.f32.xlu1 %v325_v15  ;;  %329 = vadd.xlane.f32.xlu0 %v328_v30  ;;  %v751_v46 = vrot.slane %v275_v7, %v3030_v63  ;;  %v747_v38 = vrot.slane %v274_v10, %v3035_v14  ;;  %v790_v23 = vsel %vm3911_vm4, %v743_v60, %v789_v3 }
  0xb2   : > { %v277_v34 = vmul.f32 0.03125, %v248_v27  ;;  %v276_v35 = vmul.f32 0.03125, %v245_v31  ;;  %v306_v36 = vmul.f32 %v290_v22, %v290_v22  ;;  %v307_v40 = vmul.f32 %v291_v19, %v291_v19 }
  0xb3   : > { %v752_v4 = vsel %vm549_vm2, %v751_v46, %v747_v38 }
  0xb4   : > { %v293_v43 = vsub.f32 %v2951_v16, %v277_v34  ;;  %v292_v44 = vsub.f32 %v2954_v17, %v276_v35  ;;  %v334_v49 = vsel %vm3902_vm0, %v306_v36, 0.0  ;;  %v760_v55 = vrot.slane %v277_v34, %v3030_v63 }
  0xb5   : > { %v254_v48 = vpop.xlane.xlu1 %253  ;;  %v251_v50 = vpop.xlane.xlu0 %250  ;;  %332 = vadd.xlane.f32.xlu1 %v331_v37  ;;  %335 = vadd.xlane.f32.xlu0 %v334_v49  ;;  %v756_v56 = vrot.slane %v276_v35, %v3035_v14  ;;  %v337_v57 = vsel %vm3902_vm0, %v307_v40, 0.0  ;;  %v791_v36 = vsel %vm3910_vm5, %v752_v4, %v790_v23  ;;  %v520_v4 = vld [vmem:[%s3899_s2 + $0x18] sm:$0xff] }
  0xb6   : > { %v279_v52 = vmul.f32 0.03125, %v254_v48  ;;  %v278_v53 = vmul.f32 0.03125, %v251_v50  ;;  %v308_v54 = vmul.f32 %v292_v44, %v292_v44  ;;  %v309_v59 = vmul.f32 %v293_v43, %v293_v43  ;;  %2455 = vmatpush3.msra.mxu0 %v520_v4 }
  0xb7   : > { %v761_v26 = vsel %vm549_vm2, %v760_v55, %v756_v56  ;;  %2456 = vmatprep.subr.mxu0 %v2828_v33 }
  0xb8   : > { %v295_v61 = vsub.f32 %v2961_v20, %v279_v52  ;;  %v294_v62 = vsub.f32 %v2964_v21, %v278_v53  ;;  %v769_v6 = vrot.slane %v279_v52, %v3030_v63  ;;  %v340_v10 = vsel %vm3902_vm0, %v308_v54, 0.0 }
  0xb9   : > { %v260_v7 = vpop.xlane.xlu1 %259  ;;  %v257_v11 = vpop.xlane.xlu0 %256  ;;  %v765_v15 = vrot.slane %v278_v53, %v3035_v14  ;;  %338 = vadd.xlane.f32.xlu1 %v337_v57  ;;  %341 = vadd.xlane.f32.xlu0 %v340_v10  ;;  %v343_v27 = vsel %vm3902_vm0, %v309_v59, 0.0  ;;  %v792_v45 = vsel %vm3909_vm6, %v761_v26, %v791_v36  ;;  %v511_v10 = vpack.c.bf16 %v2941_v12, %v2944_v13 }
  0xba   : > { %v281_v18 = vmul.f32 0.03125, %v260_v7  ;;  %v280_v19 = vmul.f32 0.03125, %v257_v11  ;;  %v310_v22 = vmul.f32 %v294_v62, %v294_v62  ;;  %v311_v30 = vmul.f32 %v295_v61, %v295_v61  ;;  %v3114_v11 = vld [vmem:[%s3898_s1] sm:$0xf] }
  0xbb   : > { %v770_v41 = vsel %vm549_vm2, %v769_v6, %v765_v15  ;;  %v519_v6 = vld [vmem:[%s3899_s2 + $0x10] sm:$0xff]  ;;  %v509_v7 = vpack.c.bf16 %v2917_v2, %v2911_v0  ;;  %v513_v0 = vpack.c.bf16 %v2961_v20, %v2964_v21  ;;  %v515_v2 = vpack.c.bf16 %v2981_v28, %v2984_v29 }
  0xbc   : > { %v297_v31 = vsub.f32 %v2971_v24, %v281_v18  ;;  %v778_v32 = vrot.slane %v281_v18, %v3030_v63  ;;  %v296_v34 = vsub.f32 %v2974_v25, %v280_v19  ;;  %v774_v35 = vrot.slane %v280_v19, %v3035_v14  ;;  %2457 = vmatpush3.msra.mxu0 %v519_v6 }
  0xbd   : > { %v266_v39 = vpop.xlane.xlu1 %265  ;;  %v346_v37 = vsel %vm3902_vm0, %v310_v22, 0.0  ;;  %v263_v40 = vpop.xlane.xlu0 %262  ;;  %344 = vadd.xlane.f32.xlu1 %v343_v27  ;;  %v349_v38 = vsel %vm3902_vm0, %v311_v30, 0.0  ;;  %v793_v54 = vsel %vm3908_vm7, %v770_v41, %v792_v45  ;;  %2468 = vmatprep.subr.bf16.mxu0 %v2828_v33 }
  0xbe   : > { %v283_v42 = vmul.f32 0.03125, %v266_v39  ;;  %347 = vadd.xlane.f32.xlu0 %v346_v37  ;;  %v282_v43 = vmul.f32 0.03125, %v263_v40  ;;  %v312_v44 = vmul.f32 %v296_v34, %v296_v34  ;;  %v779_v46 = vsel %vm549_vm2, %v778_v32, %v774_v35 }
  0xbf   : > { %v313_v48 = vmul.f32 %v297_v31, %v297_v31  ;;  %v794_v56 = vsel %vm3907_vm8, %v779_v46, %v793_v54 }
  0xc0   : > { %v299_v49 = vsub.f32 %v2981_v28, %v283_v42  ;;  %v787_v50 = vrot.slane %v283_v42, %v3030_v63  ;;  %v298_v51 = vsub.f32 %v2984_v29, %v282_v43  ;;  %v783_v52 = vrot.slane %v282_v43, %v3035_v14 }
  0xc1   : > { %v352_v53 = vsel %vm3902_vm0, %v312_v44, 0.0  ;;  %350 = vadd.xlane.f32.xlu1 %v349_v38  ;;  %v355_v60 = vsel %vm3902_vm0, %v313_v48, 0.0 }
  0xc2   : > { %353 = vadd.xlane.f32.xlu0 %v352_v53  ;;  %v788_v55 = vsel %vm549_vm2, %v787_v50, %v783_v52  ;;  %v314_v57 = vmul.f32 %v298_v51, %v298_v51  ;;  %v315_v61 = vmul.f32 %v299_v49, %v299_v49 }
  0xc3   : > { %v795_v59 = vsel %vm3906_vm9, %v788_v55, %v794_v56 }
  0xc4   : > { %2466 = vmatmul.mubr.msk.f32.vlgmr.msra.gmra.mxu1 %vm3905_vm10, %v795_v59  ;;  %v358_v62 = vsel %vm3902_vm0, %v314_v57, 0.0  ;;  %v361_v3 = vsel %vm3902_vm0, %v315_v61, 0.0 }
  0xc5   : > { %2476 = vmatprep.mubr.msk.bf16.mxu1 %vm3903_vm1, %v2828_v33  ;;  %356 = vadd.xlane.f32.xlu1 %v355_v60 }
  0xc6   : > { %359 = vadd.xlane.f32.xlu0 %v358_v62  ;;  %2475 = vmatpush3.bf16.msra.mxu1 %v509_v7 }
  0xc7   : > { %2486 = vmatprep.subr.bf16.mxu1 %v2828_v33 }
  0xc9   : > { %362 = vadd.xlane.f32.xlu1 %v361_v3  ;;  %2477 = vmatmul.mubr.msk.bf16.vlgmr.msra.gmra.mxu1 %vm3905_vm10, %v3114_v11 }
  0xca   : > { %2487 = vmatpush3.bf16.msra.mxu1 %v511_v10  ;;  %2488 = vmatprep.mubr.msk.bf16.mxu1 %vm3903_vm1, %v2828_v33 }
  0xcb   : > { %2498 = vmatprep.subr.bf16.mxu1 %v2828_v33 }
  0xd1   : > { %2489 = vmatmul.mubr.msk.bf16.vlgmr.msra.gmra.mxu1 %vm3905_vm10, %v3114_v11 }
  0xd2   : > { %2499 = vmatpush3.bf16.msra.mxu1 %v513_v0  ;;  %2500 = vmatprep.mubr.msk.bf16.mxu1 %vm3903_vm1, %v2828_v33 }
  0xd3   : > { %2510 = vmatprep.subr.bf16.mxu1 %v2828_v33 }
  0xd9   : > { %2501 = vmatmul.mubr.msk.bf16.vlgmr.msra.gmra.mxu1 %vm3905_vm10, %v3114_v11 }
  0xda   : > { %2511 = vmatpush3.bf16.msra.mxu1 %v515_v2  ;;  %2512 = vmatprep.mubr.msk.bf16.mxu1 %vm3903_vm1, %v2828_v33 }
  0xdb   : > { %2522 = vmatprep.subr.bf16.mxu1 %v2828_v33 }
  0xe1   : > { %2513 = vmatmul.mubr.msk.bf16.vlgmr.msra.gmra.mxu1 %vm3905_vm10, %v3114_v11 }
  0xe2   : > { %2524 = vmatprep.mubr.msk.bf16.mxu1 %vm3903_vm1, %v2828_v33 }
 0x132   : > { %v318_v12 = vpop.xlane.xlu0 %317 }
 0x133   : > { %v364_v13 = vmul.f32 0.03125, %v318_v12 }
 0x135   : > { %v3139_v20 = vmax.f32 %v364_v13, 0.0001 }
 0x136   : > { %v324_v21 = vpop.xlane.xlu0 %323  ;;  %v321_v28 = vpop.xlane.xlu1 %320 }
 0x137   : > { %2606 = vrsqrt.f32 %v3139_v20  ;;  %v365_v29 = vmul.f32 0.03125, %v321_v28  ;;  %v366_v15 = vmul.f32 0.03125, %v324_v21  ;;  %vm398_vm11 = vcmp.eq.f32.partialorder %v3139_v20, inf }
 0x138   : > { %vm400_vm12 = vcmp.eq.f32.partialorder %v3139_v20, 0.0  ;;  %v401_v54 = vand.u32 2147483648, %v3139_v20 }
 0x139   : > { %v3142_v18 = vmax.f32 %v365_v29, 0.0001  ;;  %v3144_v19 = vmax.f32 %v366_v15, 0.0001 }
 0x13a   : > { %v327_v22 = vpop.xlane.xlu1 %326  ;;  %v330_v23 = vpop.xlane.xlu0 %329 }
 0x13b   : > { %2608 = vrsqrt.f32 %v3142_v18  ;;  %v367_v26 = vmul.f32 0.03125, %v327_v22  ;;  %v368_v27 = vmul.f32 0.03125, %v330_v23  ;;  %vm405_vm13 = vcmp.eq.f32.partialorder %v3142_v18, inf }
 0x13c   : > { %2610 = vrsqrt.f32 %v3144_v19  ;;  %vm407_vm14 = vcmp.eq.f32.partialorder %v3142_v18, 0.0  ;;  %v408_v55 = vand.u32 2147483648, %v3142_v18  ;;  %vm412_vm15 = vcmp.eq.f32.partialorder %v3144_v19, inf }
 0x13d   : > { %v3148_v32 = vmax.f32 %v367_v26, 0.0001  ;;  %v3150_v34 = vmax.f32 %v368_v27, 0.0001  ;;  %vm414_vm0 = vcmp.eq.f32.partialorder %v3144_v19, 0.0  ;;  %v415_v6 = vand.u32 2147483648, %v3144_v19 }
 0x13e   : > { %v333_v30 = vpop.xlane.xlu1 %332  ;;  %v336_v31 = vpop.xlane.xlu0 %335 }
 0x13f   : > { %v369_v35 = vmul.f32 0.03125, %v333_v30  ;;  %v370_v36 = vmul.f32 0.03125, %v336_v31  ;;  %2612 = vrsqrt.f32 %v3148_v32  ;;  %vm419_vm1 = vcmp.eq.f32.partialorder %v3148_v32, inf }
 0x140   : > { %2614 = vrsqrt.f32 %v3150_v34  ;;  %v422_v7 = vand.u32 2147483648, %v3148_v32  ;;  %vm426_vm10 = vcmp.eq.f32.partialorder %v3150_v34, inf  ;;  %v429_v2 = vand.u32 2147483648, %v3150_v34 }
 0x141   : > { %v3154_v40 = vmax.f32 %v369_v35, 0.0001  ;;  %v3156_v41 = vmax.f32 %v370_v36, 0.0001 }
 0x142   : > { %v339_v39 = vpop.xlane.xlu1 %338  ;;  %v342_v37 = vpop.xlane.xlu0 %341 }
 0x143   : > { %v371_v42 = vmul.f32 0.03125, %v339_v39  ;;  %v372_v43 = vmul.f32 0.03125, %v342_v37  ;;  %2616 = vrsqrt.f32 %v3154_v40  ;;  %v436_v29 = vand.u32 2147483648, %v3154_v40 }
 0x144   : > { %v2607_v44 = vpop.eup %2606  ;;  %2618 = vrsqrt.f32 %v3156_v41  ;;  %vm440_vm9 = vcmp.eq.f32.partialorder %v3156_v41, inf  ;;  %v443_v31 = vand.u32 2147483648, %v3156_v41 }
 0x145   : > { %v397_v38 = vmul.f32 %v2607_v44, %v3139_v20  ;;  %v3161_v48 = vmax.f32 %v371_v42, 0.0001  ;;  %v3163_v49 = vmax.f32 %v372_v43, 0.0001 }
 0x146   : > { %v345_v45 = vpop.xlane.xlu1 %344 }
 0x147   : > { %v348_v46 = vpop.xlane.xlu0 %347  ;;  %v373_v51 = vmul.f32 0.03125, %v345_v45  ;;  %2620 = vrsqrt.f32 %v3161_v48  ;;  %v399_v59 = vsel %vm398_vm11, %v3139_v20, %v397_v38  ;;  %vm421_vm11 = vcmp.eq.f32.partialorder %v3148_v32, 0.0 }
 0x148   : > { %v2609_v50 = vpop.eup %2608  ;;  %v374_v52 = vmul.f32 0.03125, %v348_v46  ;;  %2622 = vrsqrt.f32 %v3163_v49  ;;  %v3188_v0 = vsel %vm400_vm12, %v401_v54, %v399_v59  ;;  %vm433_vm12 = vcmp.eq.f32.partialorder %v3154_v40, inf }
 0x149   : > { %v2611_v53 = vpop.eup %2610  ;;  %v404_v60 = vmul.f32 %v2609_v50, %v3142_v18  ;;  %v3176_v62 = vmax.f32 %v373_v51, 0.0001  ;;  %v543_v30 = vrot.slane %v3188_v0, %v3035_v14  ;;  %vm447_vm8 = vcmp.eq.f32.partialorder %v3161_v48, inf }
 0x14a   : > { %v351_v56 = vpop.xlane.xlu1 %350  ;;  %v411_v61 = vmul.f32 %v2611_v53, %v3144_v19  ;;  %v3180_v3 = vmax.f32 %v374_v52, 0.0001  ;;  %v450_v39 = vand.u32 2147483648, %v3161_v48  ;;  %vm454_vm7 = vcmp.eq.f32.partialorder %v3163_v49, inf }
 0x14b   : > { %v354_v57 = vpop.xlane.xlu0 %353  ;;  %v375_v4 = vmul.f32 0.03125, %v351_v56  ;;  %2624 = vrsqrt.f32 %v3176_v62  ;;  %v406_v28 = vsel %vm405_vm13, %v3142_v18, %v404_v60  ;;  %vm428_vm13 = vcmp.eq.f32.partialorder %v3150_v34, 0.0 }
 0x14c   : > { %v2613_v10 = vpop.eup %2612  ;;  %2626 = vrsqrt.f32 %v3180_v3  ;;  %v413_v20 = vsel %vm412_vm15, %v3144_v19, %v411_v61  ;;  %v376_v23 = vmul.f32 0.03125, %v354_v57  ;;  %v3213_v36 = vsel %vm407_vm14, %v408_v55, %v406_v28 }
 0x14d   : > { %v2615_v21 = vpop.eup %2614  ;;  %v3202_v15 = vmax.f32 %v375_v4, 0.0001  ;;  %v418_v22 = vmul.f32 %v2613_v10, %v3148_v32  ;;  %vm435_vm15 = vcmp.eq.f32.partialorder %v3154_v40, 0.0  ;;  %v3224_v45 = vsel %vm414_vm0, %v415_v6, %v413_v20 }
 0x14e   : > { %v357_v12 = vpop.xlane.xlu1 %356  ;;  %v3218_v37 = vmax.f32 %v376_v23, 0.0001  ;;  %v425_v18 = vmul.f32 %v2615_v21, %v3150_v34  ;;  %vm442_vm14 = vcmp.eq.f32.partialorder %v3156_v41, 0.0  ;;  %v548_v19 = vrot.slane %v3213_v36, %v3030_v63 }
 0x14f   : > { %v360_v13 = vpop.xlane.xlu0 %359  ;;  %v377_v26 = vmul.f32 0.03125, %v357_v12  ;;  %2628 = vrsqrt.f32 %v3202_v15  ;;  %v420_v38 = vsel %vm419_vm1, %v3148_v32, %v418_v22  ;;  %vm449_vm0 = vcmp.eq.f32.partialorder %v3161_v48, 0.0 }
 0x150   : > { %v378_v27 = vmul.f32 0.03125, %v360_v13  ;;  %v2617_v35 = vpop.eup %2616  ;;  %2630 = vrsqrt.f32 %v3218_v37  ;;  %v457_v53 = vand.u32 2147483648, %v3163_v49  ;;  %v554_v55 = vrot.slane %v3224_v45, %v3035_v14 }
 0x151   : > { %v3220_v42 = vmax.f32 %v377_v26, 0.0001  ;;  %v2619_v44 = vpop.eup %2618  ;;  %v432_v50 = vmul.f32 %v2617_v35, %v3154_v40  ;;  %vm456_vm1 = vcmp.eq.f32.partialorder %v3163_v49, 0.0  ;;  %vm461_vm6 = vcmp.eq.f32.partialorder %v3176_v62, inf }
 0x152   : > { %v363_v43 = vpop.xlane.xlu1 %362  ;;  %v3229_v46 = vmax.f32 %v378_v27, 0.0001  ;;  %v439_v52 = vmul.f32 %v2619_v44, %v3156_v41  ;;  %v423_v59 = vsel %vm421_vm11, %v422_v7, %v420_v38  ;;  %v427_v60 = vsel %vm426_vm10, %v3150_v34, %v425_v18 }
 0x153   : > { %v379_v51 = vmul.f32 0.03125, %v363_v43  ;;  %2632 = vrsqrt.f32 %v3220_v42  ;;  %vm463_vm5 = vcmp.eq.f32.partialorder %v3176_v62, 0.0  ;;  %v464_v4 = vand.u32 2147483648, %v3176_v62 }
 0x154   : > { %v2621_v54 = vpop.eup %2620  ;;  %2634 = vrsqrt.f32 %v3229_v46  ;;  %v434_v6 = vsel %vm433_vm12, %v3154_v40, %v432_v50  ;;  %vm468_vm4 = vcmp.eq.f32.partialorder %v3180_v3, inf  ;;  %v441_v32 = vsel %vm440_vm9, %v3156_v41, %v439_v52 }
 0x155   : > { %v3247_v56 = vmax.f32 %v379_v51, 0.0001  ;;  %v2623_v57 = vpop.eup %2622  ;;  %v446_v61 = vmul.f32 %v2621_v54, %v3161_v48  ;;  %v471_v7 = vand.u32 2147483648, %v3180_v3  ;;  %vm475_vm10 = vcmp.eq.f32.partialorder %v3202_v15, inf }
 0x156   : > { %v453_v10 = vmul.f32 %v2623_v57, %v3163_v49  ;;  %v478_v12 = vand.u32 2147483648, %v3202_v15  ;;  %v558_v21 = vrot.slane %v423_v59, %v3030_v63  ;;  %v430_v28 = vsel %vm428_vm13, %v429_v2, %v427_v60 }
 0x157   : > { %2636 = vrsqrt.f32 %v3247_v56  ;;  %vm470_vm11 = vcmp.eq.f32.partialorder %v3180_v3, 0.0  ;;  %vm477_vm12 = vcmp.eq.f32.partialorder %v3202_v15, 0.0  ;;  %v437_v22 = vsel %vm435_vm15, %v436_v29, %v434_v6 }
 0x158   : > { %v2625_v13 = vpop.eup %2624  ;;  %v448_v23 = vsel %vm447_vm8, %v3161_v48, %v446_v61  ;;  %vm482_vm9 = vcmp.eq.f32.partialorder %v3218_v37, inf  ;;  %v455_v34 = vsel %vm454_vm7, %v3163_v49, %v453_v10  ;;  %v444_v27 = vsel %vm442_vm14, %v443_v31, %v441_v32 }
 0x159   : > { %v2627_v20 = vpop.eup %2626  ;;  %v460_v26 = vmul.f32 %v2625_v13, %v3176_v62  ;;  %vm484_vm13 = vcmp.eq.f32.partialorder %v3218_v37, 0.0  ;;  %v485_v29 = vand.u32 2147483648, %v3218_v37  ;;  %vm489_vm8 = vcmp.eq.f32.partialorder %v3220_v42, inf }
 0x15a   : > { %v467_v2 = vmul.f32 %v2627_v20, %v3180_v3  ;;  %vm491_vm15 = vcmp.eq.f32.partialorder %v3220_v42, 0.0  ;;  %v451_v36 = vsel %vm449_vm0, %v450_v39, %v448_v23  ;;  %v492_v43 = vand.u32 2147483648, %v3220_v42 }
 0x15b   : > { %v462_v40 = vsel %vm461_vm6, %v3176_v62, %v460_v26  ;;  %vm496_vm7 = vcmp.eq.f32.partialorder %v3229_v46, inf  ;;  %vm498_vm14 = vcmp.eq.f32.partialorder %v3229_v46, 0.0  ;;  %v458_v31 = vsel %vm456_vm1, %v457_v53, %v455_v34 }
 0x15c   : > { %v2629_v35 = vpop.eup %2628  ;;  %v499_v44 = vand.u32 2147483648, %v3229_v46  ;;  %vm503_vm6 = vcmp.eq.f32.partialorder %v3247_v56, inf  ;;  %v465_v45 = vsel %vm463_vm5, %v464_v4, %v462_v40  ;;  %v469_v48 = vsel %vm468_vm4, %v3180_v3, %v467_v2 }
 0x15d   : > { %v474_v41 = vmul.f32 %v2629_v35, %v3202_v15  ;;  %v506_v39 = vand.u32 2147483648, %v3247_v56  ;;  %v550_v18 = vsel %vm549_vm2, %v548_v19, %v543_v30  ;;  %v2631_v49 = vpop.eup %2630  ;;  %v559_v50 = vsel %vm549_vm2, %v558_v21, %v554_v55 }
 0x15e   : > { %v567_v62 = vrot.slane %v437_v22, %v3030_v63  ;;  %v576_v51 = vrot.slane %v451_v36, %v3030_v63  ;;  %v481_v53 = vmul.f32 %v2631_v49, %v3218_v37  ;;  %v563_v0 = vrot.slane %v430_v28, %v3035_v14 }
 0x15f   : > { %v476_v38 = vsel %vm475_vm10, %v3202_v15, %v474_v41  ;;  %v572_v30 = vrot.slane %v444_v27, %v3035_v14  ;;  %v472_v55 = vsel %vm470_vm11, %v471_v7, %v469_v48  ;;  %v581_v59 = vrot.slane %v458_v31, %v3035_v14 }
 0x160   : > { %v2633_v52 = vpop.eup %2632  ;;  %v479_v54 = vsel %vm477_vm12, %v478_v12, %v476_v38  ;;  %v585_v60 = vrot.slane %v465_v45, %v3030_v63  ;;  %v483_v61 = vsel %vm482_vm9, %v3218_v37, %v481_v53  ;;  %v615_v6 = vsel %vm614_vm3, %v559_v50, %v550_v18  ;;  %v2393_v38 = vld [vmem:[%s3899_s2 + $0x20] ss:$0 sm:$0xff] }
 0x161   : > { %v2635_v19 = vpop.eup %2634  ;;  %v488_v57 = vmul.f32 %v2633_v52, %v3220_v42  ;;  %v594_v4 = vrot.slane %v479_v54, %v3030_v63  ;;  %v486_v32 = vsel %vm484_vm13, %v485_v29, %v483_v61  ;;  %v568_v7 = vsel %vm549_vm2, %v567_v62, %v563_v0 }
 0x162   : > { %v495_v15 = vmul.f32 %v2635_v19, %v3229_v46  ;;  %v577_v12 = vsel %vm549_vm2, %v576_v51, %v572_v30  ;;  %v590_v37 = vrot.slane %v472_v55, %v3035_v14  ;;  %v586_v22 = vsel %vm549_vm2, %v585_v60, %v581_v59 }
 0x163   : > { %v490_v3 = vsel %vm489_vm8, %v3220_v42, %v488_v57  ;;  %v599_v23 = vrot.slane %v486_v32, %v3035_v14  ;;  %vm505_vm4 = vcmp.eq.f32.partialorder %v3247_v56, 0.0  ;;  %vm3914_vm5 = vcmask 1042434  }
 0x164   : > { %v2637_v10 = vpop.eup %2636  ;;  %v493_v13 = vsel %vm491_vm15, %v492_v43, %v490_v3  ;;  %v497_v21 = vsel %vm496_vm7, %v3229_v46, %v495_v15  ;;  %v595_v34 = vsel %vm549_vm2, %v594_v4, %v590_v37  ;;  %v617_v2 = vsel %vm3914_vm5, %v568_v7, %v615_v6 }
 0x165   : > { %v502_v28 = vmul.f32 %v2637_v10, %v3247_v56  ;;  %v500_v20 = vsel %vm498_vm14, %v499_v44, %v497_v21  ;;  %v603_v26 = vrot.slane %v493_v13, %v3030_v63  ;;  %vm3915_vm0 = vcmask 1043459  }
 0x166   : > { %v619_v40 = vsel %vm3915_vm0, %v577_v12, %v617_v2  ;;  %v608_v29 = vrot.slane %v500_v20, %v3035_v14  ;;  %vm3916_vm1 = vcmask 1044484   ;;  %vm3917_vm10 = vcmask 1045509  }
 0x167   : > { %v504_v42 = vsel %vm503_vm6, %v3247_v56, %v502_v28  ;;  %v604_v46 = vsel %vm549_vm2, %v603_v26, %v599_v23  ;;  %v621_v36 = vsel %vm3916_vm1, %v586_v22, %v619_v40  ;;  %v508_v56 = vpack.c.bf16 %v2924_v5, %v2914_v1 }
 0x168   : > { %v507_v27 = vsel %vm505_vm4, %v506_v39, %v504_v42  ;;  %v623_v43 = vsel %vm3917_vm10, %v595_v34, %v621_v36  ;;  %vm3918_vm11 = vcmask 1046534   ;;  %vm3919_vm12 = vcmask 1047559  }
 0x169   : > { %v612_v35 = vrot.slane %v507_v27, %v3030_v63  ;;  %v625_v31 = vsel %vm3918_vm11, %v604_v46, %v623_v43  ;;  %vm3920_vm9 = vcmask 130048   ;;  %vm3921_vm13 = vmmov 0  }
 0x16a   : > { %v510_v45 = vpack.c.bf16 %v2931_v8, %v2934_v9  ;;  %vm3922_vm8 = vmmov %vm3920_vm9  ;;  %v512_v1 = vpack.c.bf16 %v2951_v16, %v2954_v17  ;;  %v514_v5 = vpack.c.bf16 %v2971_v24, %v2974_v25  ;;  %v875_v51 = vsub.s32 0, %v3024_v58 }
 0x16b   : > { %v613_v41 = vsel %vm549_vm2, %v612_v35, %v608_v29  ;;  %vm3923_vm15 = vmmov %vm3922_vm8  ;;  %v889_v19 = vsub.s32 2, %v3024_v58  ;;  %v903_v57 = vsub.s32 4, %v3024_v58  ;;  %v896_v15 = vsub.s32 3, %v3024_v58 }
 0x16c   : > { %v627_v44 = vsel %vm3919_vm12, %v613_v41, %v625_v31  ;;  %vm3924_vm7 = vmmov %vm3922_vm8  ;;  %v917_v4 = vsub.s32 6, %v3024_v58  ;;  %v910_v7 = vsub.s32 5, %v3024_v58  ;;  %v924_v20 = vsub.s32 7, %v3024_v58 }
 0x16d   : > { %2459 = vmatmul.mubr.msk.f32.vlgmr.msra.gmra.mxu0 %vm3920_vm9, %v627_v44  ;;  %vm3925_vm14 = vmmov %vm3924_vm7  ;;  %vm1279_vm6 = vcmask 1043456   ;;  %vm1275_vm4 = vcmask 64512   ;;  %vm3926_vm5 = vcmask 261120  }
 0x16e   : > { %2469 = vmatpush3.bf16.msra.mxu0 %v508_v56  ;;  %2470 = vmatprep.mubr.msk.bf16.mxu0 %vm3921_vm13, %v2828_v33  ;;  %vm3927_vm0 = vmmov %vm3926_vm5 }
 0x16f   : > { %2480 = vmatprep.subr.bf16.mxu0 %v2828_v33  ;;  %vm3928_vm1 = vmmov %vm3927_vm0 }
 0x170   : > { %vm3929_vm10 = vmmov %vm3927_vm0 }
 0x171   : > { %2471 = vmatmul.mubr.msk.bf16.vlgmr.msra.gmra.mxu0 %vm3922_vm8, %v3114_v11  ;;  %vm3930_vm11 = vmmov %vm3927_vm0 }
 0x172   : > { %2481 = vmatpush3.bf16.msra.mxu0 %v510_v45  ;;  %2482 = vmatprep.mubr.msk.bf16.mxu0 %vm3921_vm13, %v2828_v33  ;;  %vm3931_vm12 = vmmov %vm3927_vm0 }
 0x173   : > { %2492 = vmatprep.subr.bf16.mxu0 %v2828_v33  ;;  %vm3932_vm9 = vmmov %vm3927_vm0 }
 0x174   : > { %vm3934_vm8 = vmmov %vm3927_vm0 }
 0x179   : > { %2483 = vmatmul.mubr.msk.bf16.vlgmr.msra.gmra.mxu0 %vm3923_vm15, %v3114_v11  ;;  %vm3935_vm15 = vmmov %vm3927_vm0 }
 0x17a   : > { %2493 = vmatpush3.bf16.msra.mxu0 %v512_v1  ;;  %2494 = vmatprep.mubr.msk.bf16.mxu0 %vm3921_vm13, %v2828_v33 }
 0x17b   : > { %2504 = vmatprep.subr.bf16.mxu0 %v2828_v33 }
 0x181   : > { %2495 = vmatmul.mubr.msk.bf16.vlgmr.msra.gmra.mxu0 %vm3924_vm7, %v3114_v11  ;;  %vm3936_vm7 = vmmov %vm3927_vm0 }
 0x182   : > { %2505 = vmatpush3.bf16.msra.mxu0 %v514_v5  ;;  %2506 = vmatprep.mubr.msk.bf16.mxu0 %vm3921_vm13, %v2828_v33 }
 0x183   : > { %2516 = vmatprep.subr.bf16.mxu0 %v2828_v33 }
 0x184   : > { %v864_v8 = vpop.f32.mrf.mxu1 }
 0x186   : > { %v2467_v9 = vpop.f32.mrf.mxu1 }
 0x189   : > { %2507 = vmatmul.mubr.msk.bf16.vlgmr.msra.gmra.mxu0 %vm3925_vm14, %v3114_v11  ;;  %v3403_v16 = vpop.f32.mrf.mxu1  ;;  %v882_v11 = vsub.s32 1, %v3024_v58  ;;  %vm3937_vm14 = vmmov %vm3927_vm0 }
 0x18a   : > { %2518 = vmatprep.mubr.msk.bf16.mxu0 %vm3921_vm13, %v2828_v33 }
 0x18b   : > { %v2478_v17 = vpop.f32.mrf.mxu1 }
 0x18d   : > { %v1009_v24 = vpop.f32.mrf.mxu1 }
 0x18f   : > { %v2479_v25 = vpop.f32.mrf.mxu1 }
 0x191   : > { %v3405_v48 = vpop.f32.mrf.mxu1 }
 0x193   : > { %v2490_v39 = vpop.f32.mrf.mxu1 }
 0x195   : > { %v1089_v18 = vpop.f32.mrf.mxu1 }
 0x197   : > { %v2491_v49 = vpop.f32.mrf.mxu1 }
 0x199   : > { %v1166_v12 = vpop.f32.mrf.mxu1 }
 0x19b   : > { %v2502_v21 = vpop.f32.mrf.mxu1 }
 0x19d   : > { %v1169_v22 = vpop.f32.mrf.mxu1 }
 0x19f   : > { %v2503_v26 = vpop.f32.mrf.mxu1 }
 0x1a1   : > { %v1246_v2 = vpop.f32.mrf.mxu1 }
 0x1a3   : > { %v2514_v46 = vpop.f32.mrf.mxu1 }
 0x1a5   : > { %v1249_v29 = vpop.f32.mrf.mxu1 }
 0x1a7   : > { %v2515_v36 = vpop.f32.mrf.mxu1 }
 0x22d   : > { %v697_v50 = vpop.f32.mrf.mxu0 }
 0x22e   : > { %v865_v62 = vadd.f32 %v864_v8, %v697_v50 }
 0x22f   : > { %v2460_v52 = vpop.f32.mrf.mxu0 }
 0x230   : > { %v872_v53 = vadd.f32 %v2393_v38, %v865_v62 }
 0x231   : > { %v966_v54 = vpop.f32.mrf.mxu0 }
 0x232   : > { %v883_v0 = vrot.slane %v872_v53, %v882_v11  ;;  %v876_v30 = vrot.slane %v872_v53, %v875_v51  ;;  %v890_v60 = vrot.slane %v872_v53, %v889_v19  ;;  %v904_v61 = vrot.slane %v872_v53, %v903_v57 }
 0x233   : > { %v2472_v55 = vpop.f32.mrf.mxu0  ;;  %v897_v32 = vrot.slane %v872_v53, %v896_v15  ;;  %v918_v3 = vrot.slane %v872_v53, %v917_v4  ;;  %v911_v37 = vrot.slane %v872_v53, %v910_v7  ;;  %v925_v34 = vrot.slane %v872_v53, %v924_v20 }
 0x234   : > { %885 = vbcast.lane.b32.xlu1 %v883_v0, 256  ;;  %878 = vbcast.lane.b32.xlu0 %v876_v30, 256 }
 0x235   : > { %v969_v59 = vpop.f32.mrf.mxu0 }
 0x237   : > { %v2473_v6 = vpop.f32.mrf.mxu0 }
 0x238   : > { %892 = vbcast.lane.b32.xlu1 %v890_v60, 256  ;;  %906 = vbcast.lane.b32.xlu0 %v904_v61, 256 }
 0x239   : > { %v1046_v10 = vpop.f32.mrf.mxu0 }
 0x23b   : > { %v2484_v13 = vpop.f32.mrf.mxu0 }
 0x23c   : > { %899 = vbcast.lane.b32.xlu1 %v897_v32, 256  ;;  %920 = vbcast.lane.b32.xlu0 %v918_v3, 256 }
 0x23d   : > { %v1049_v28 = vpop.f32.mrf.mxu0 }
 0x23f   : > { %v2485_v23 = vpop.f32.mrf.mxu0 }
 0x240   : > { %913 = vbcast.lane.b32.xlu1 %v911_v37, 256 }
 0x241   : > { %v1126_v42 = vpop.f32.mrf.mxu0 }
 0x243   : > { %v2496_v27 = vpop.f32.mrf.mxu0 }
 0x244   : > { %927 = vbcast.lane.b32.xlu1 %v925_v34, 256 }
 0x245   : > { %v1129_v40 = vpop.f32.mrf.mxu0 }
 0x247   : > { %v2497_v35 = vpop.f32.mrf.mxu0 }
 0x249   : > { %v1206_v43 = vpop.f32.mrf.mxu0 }
 0x24b   : > { %v2508_v56 = vpop.f32.mrf.mxu0 }
 0x24d   : > { %v1209_v41 = vpop.f32.mrf.mxu0 }
 0x24f   : > { %v2509_v31 = vpop.f32.mrf.mxu0 }
 0x2a6   : > { %v886_v44 = vpop.permute.xlu1 %885  ;;  %v879_v45 = vpop.permute.xlu0 %878 }
 0x2a7   : > { %v1007_v1 = vadd.f32 %v3403_v16, %v886_v44  ;;  %v967_v5 = vadd.f32 %v966_v54, %v879_v45 }
 0x2a9   : > { %2638 = vtanh.f32 %v1007_v1 }
 0x2aa   : > { %2640 = vtanh.f32 %v967_v5  ;;  %v893_v8 = vpop.permute.xlu1 %892  ;;  %v907_v17 = vpop.permute.xlu0 %906 }
 0x2ab   : > { %v1047_v9 = vadd.f32 %v1046_v10, %v893_v8  ;;  %v1127_v24 = vadd.f32 %v1126_v42, %v907_v17 }
 0x2ad   : > { %2642 = vtanh.f32 %v1047_v9 }
 0x2ae   : > { %v900_v25 = vpop.permute.xlu1 %899  ;;  %v921_v49 = vpop.permute.xlu0 %920 }
 0x2af   : > { %v1087_v39 = vadd.f32 %v3405_v48, %v900_v25  ;;  %v1207_v62 = vadd.f32 %v1206_v43, %v921_v49  ;;  %v2605_v48 = vld [vmem:[%s3900_s3] sm:$0xff]  }
 0x2b1   : > { %2644 = vtanh.f32 %v1087_v39 }
 0x2b2   : > { %2646 = vtanh.f32 %v1127_v24  ;;  %v914_v18 = vpop.permute.xlu1 %913 }
 0x2b3   : > { %v1167_v38 = vadd.f32 %v1166_v12, %v914_v18 }
 0x2b5   : > { %2648 = vtanh.f32 %v1167_v38 }
 0x2b6   : > { %v2639_v50 = vpop.eup %2638  ;;  %v928_v16 = vpop.permute.xlu1 %927 }
 0x2b7   : > { %v2641_v11 = vpop.eup %2640  ;;  %v1263_v51 = vpack.c.bf16 %v2639_v50, %v2639_v50  ;;  %v1247_v52 = vadd.f32 %v1246_v2, %v928_v16 }
 0x2b8   : > { %v1262_v53 = vpack.c.bf16 %v2641_v11, %v2641_v11 }
 0x2b9   : > { %2650 = vtanh.f32 %v1247_v52  ;;  %v1325_v54 = vsel %vm1279_vm6, %v1263_v51, 0 }
 0x2ba   : > { %v2643_v0 = vpop.eup %2642  ;;  %2652 = vtanh.f32 %v1207_v62  ;;  %v1281_v30 = vsel %vm1279_vm6, %v1262_v53, 0  ;;  %2523 = vmatpush3.bf16.msra.mxu1 %v1325_v54 }
 0x2bb   : > { %v1264_v19 = vpack.c.bf16 %v2643_v0, %v2643_v0  ;;  %2517 = vmatpush3.bf16.msra.mxu0 %v1281_v30  ;;  %2534 = vmatprep.subr.bf16.mxu1 %v2828_v33 }
 0x2bc   : > { %2528 = vmatprep.subr.bf16.mxu0 %v2828_v33 }
 0x2bd   : > { %2525 = vmatmul.mubr.msk.bf16.vlgmr.msra.gmra.mxu1 %vm1275_vm4, %v2605_v48  ;;  %v1369_v57 = vsel %vm1279_vm6, %v1264_v19, 0 }
 0x2be   : > { %v2645_v55 = vpop.eup %2644  ;;  %2519 = vmatmul.mubr.msk.bf16.vlgmr.msra.gmra.mxu0 %vm1275_vm4, %v2605_v48  ;;  %2536 = vmatprep.mubr.msk.bf16.mxu1 %vm3921_vm13, %v2828_v33 }
 0x2bf   : > { %v2647_v59 = vpop.eup %2646  ;;  %v1265_v60 = vpack.c.bf16 %v2645_v55, %v2645_v55  ;;  %2529 = vmatpush3.bf16.msra.mxu0 %v1369_v57  ;;  %2530 = vmatprep.mubr.msk.bf16.mxu0 %vm3921_vm13, %v2828_v33 }
 0x2c0   : > { %2540 = vmatprep.subr.bf16.mxu0 %v2828_v33  ;;  %v1266_v4 = vpack.c.bf16 %v2647_v59, %v2647_v59 }
 0x2c1   : > { %v1413_v61 = vsel %vm1279_vm6, %v1265_v60, 0 }
 0x2c2   : > { %v2649_v15 = vpop.eup %2648  ;;  %2535 = vmatpush3.bf16.msra.mxu1 %v1413_v61  ;;  %v1457_v3 = vsel %vm1279_vm6, %v1266_v4, 0 }
 0x2c3   : > { %v1267_v6 = vpack.c.bf16 %v2649_v15, %v2649_v15  ;;  %2546 = vmatprep.subr.bf16.mxu1 %v2828_v33 }
 0x2c5   : > { %2537 = vmatmul.mubr.msk.bf16.vlgmr.msra.gmra.mxu1 %vm1275_vm4, %v2605_v48  ;;  %v1501_v10 = vsel %vm1279_vm6, %v1267_v6, 0 }
 0x2c6   : > { %v2651_v32 = vpop.eup %2650  ;;  %2531 = vmatmul.mubr.msk.bf16.vlgmr.msra.gmra.mxu0 %vm1275_vm4, %v2605_v48  ;;  %2547 = vmatpush3.bf16.msra.mxu1 %v1501_v10 }
 0x2c7   : > { %v2653_v7 = vpop.eup %2652  ;;  %2541 = vmatpush3.bf16.msra.mxu0 %v1457_v3  ;;  %2542 = vmatprep.mubr.msk.bf16.mxu0 %vm3921_vm13, %v2828_v33  ;;  %v1269_v12 = vpack.c.bf16 %v2651_v32, %v2651_v32 }
 0x2c8   : > { %2548 = vmatprep.mubr.msk.bf16.mxu1 %vm3921_vm13, %v2828_v33  ;;  %2552 = vmatprep.subr.bf16.mxu0 %v2828_v33  ;;  %v1268_v13 = vpack.c.bf16 %v2653_v7, %v2653_v7 }
 0x2c9   : > { %2558 = vmatprep.subr.bf16.mxu1 %v2828_v33  ;;  %v1589_v21 = vsel %vm1279_vm6, %v1269_v12, 0 }
 0x2ca   : > { %v1545_v28 = vsel %vm1279_vm6, %v1268_v13, 0  ;;  %vm3938_vm6 = vmmov %vm3927_vm0 }
 0x2cd   : > { %2549 = vmatmul.mubr.msk.bf16.vlgmr.msra.gmra.mxu1 %vm1275_vm4, %v2605_v48 }
 0x2ce   : > { %2543 = vmatmul.mubr.msk.bf16.vlgmr.msra.gmra.mxu0 %vm1275_vm4, %v2605_v48  ;;  %2559 = vmatpush3.bf16.msra.mxu1 %v1589_v21 }
 0x2cf   : > { %2553 = vmatpush3.bf16.msra.mxu0 %v1545_v28  ;;  %2554 = vmatprep.mubr.msk.bf16.mxu0 %vm3921_vm13, %v2828_v33 }
 0x2d0   : > { %2560 = vmatprep.mubr.msk.bf16.mxu1 %vm3921_vm13, %v2828_v33  ;;  %vm3933_vm13 = vmmov %vm3927_vm0 }
 0x2d5   : > { %2561 = vmatmul.mubr.msk.bf16.vlgmr.msra.gmra.mxu1 %vm1275_vm4, %v2605_v48 }
 0x2d6   : > { %2555 = vmatmul.mubr.msk.bf16.vlgmr.msra.gmra.mxu0 %vm1275_vm4, %v2605_v48  ;;  %vm3939_vm4 = vmmov %vm3927_vm0 }
 0x37d   : > { %v3457_v37 = vpop.f32.mrf.mxu1 }
 0x37e   : > { %v3459_v20 = vpop.f32.mrf.mxu0  ;;  %v1638_v42 = vsel %vm3927_vm0, %v3457_v37, -inf }
 0x37f   : > { %v1632_v22 = vsel %vm3926_vm5, %v3459_v20, -inf  ;;  %v2526_v23 = vpop.f32.mrf.mxu1  ;;  %vm3940_vm5 = vmmov %vm3927_vm0 }
 0x380   : > { %1633 = vmax.xlane.f32.xlu0 %v1632_v22  ;;  %v2520_v26 = vpop.f32.mrf.mxu0 }
 0x381   : > { %v3465_v34 = vpop.f32.mrf.mxu1 }
 0x382   : > { %v3467_v33 = vpop.f32.mrf.mxu0  ;;  %v1641_v35 = vsel %vm3929_vm10, %v3465_v34, -inf  ;;  %vm3942_vm10 = vmmov %vm3927_vm0 }
 0x383   : > { %v1635_v2 = vsel %vm3928_vm1, %v3467_v33, -inf  ;;  %v2527_v27 = vpop.f32.mrf.mxu1  ;;  %vm3941_vm1 = vmmov %vm3927_vm0 }
 0x384   : > { %1639 = vmax.xlane.f32.xlu0 %v1638_v42  ;;  %1636 = vmax.xlane.f32.xlu1 %v1635_v2  ;;  %v2521_v46 = vpop.f32.mrf.mxu0 }
 0x385   : > { %v3471_v40 = vpop.f32.mrf.mxu1 }
 0x386   : > { %v3473_v29 = vpop.f32.mrf.mxu0  ;;  %v1650_v5 = vsel %vm3932_vm9, %v3471_v40, -inf  ;;  %vm3945_vm9 = vmmov %vm3927_vm0 }
 0x387   : > { %v2538_v36 = vpop.f32.mrf.mxu1  ;;  %v1644_v56 = vsel %vm3930_vm11, %v3473_v29, -inf  ;;  %vm3943_vm11 = vmmov %vm3927_vm0 }
 0x388   : > { %1642 = vmax.xlane.f32.xlu0 %v1641_v35  ;;  %v2532_v43 = vpop.f32.mrf.mxu0  ;;  %v2750_v35 = vld [vmem:[%s2908_s5] sm:$0xff] }
 0x389   : > { %v3479_v41 = vpop.f32.mrf.mxu1 }
 0x38a   : > { %v3481_v31 = vpop.f32.mrf.mxu0  ;;  %v1653_v8 = vsel %vm3933_vm13, %v3479_v41, -inf  ;;  %vm3946_vm13 = vmmov %vm3927_vm0 }
 0x38b   : > { %v1647_v44 = vsel %vm3931_vm12, %v3481_v31, -inf  ;;  %v2539_v45 = vpop.f32.mrf.mxu1  ;;  %vm3944_vm12 = vmmov %vm3927_vm0 }
 0x38c   : > { %1645 = vmax.xlane.f32.xlu0 %v1644_v56  ;;  %1648 = vmax.xlane.f32.xlu1 %v1647_v44  ;;  %v2533_v1 = vpop.f32.mrf.mxu0 }
 0x38d   : > { %v3489_v9 = vpop.f32.mrf.mxu1 }
 0x38e   : > { %v3491_v17 = vpop.f32.mrf.mxu0  ;;  %v1662_v16 = vsel %vm3936_vm7, %v3489_v9, -inf  ;;  %vm3949_vm7 = vmmov %vm3927_vm0 }
 0x38f   : > { %v2550_v24 = vpop.f32.mrf.mxu1  ;;  %v1656_v39 = vsel %vm3934_vm8, %v3491_v17, -inf  ;;  %vm3947_vm8 = vmmov %vm3927_vm0 }
 0x390   : > { %1651 = vmax.xlane.f32.xlu0 %v1650_v5  ;;  %1654 = vmax.xlane.f32.xlu1 %v1653_v8  ;;  %v2544_v25 = vpop.f32.mrf.mxu0 }
 0x391   : > { %v3495_v18 = vpop.f32.mrf.mxu1 }
 0x392   : > { %v3497_v49 = vpop.f32.mrf.mxu0  ;;  %v1665_v11 = vsel %vm3937_vm14, %v3495_v18, -inf  ;;  %vm3950_vm14 = vmmov %vm3927_vm0 }
 0x393   : > { %v1659_v38 = vsel %vm3935_vm15, %v3497_v49, -inf  ;;  %v2551_v50 = vpop.f32.mrf.mxu1  ;;  %vm3948_vm15 = vmmov %vm3927_vm0 }
 0x394   : > { %1657 = vmax.xlane.f32.xlu0 %v1656_v39  ;;  %1660 = vmax.xlane.f32.xlu1 %v1659_v38  ;;  %v2545_v62 = vpop.f32.mrf.mxu0 }
 0x395   : > { %v3505_v51 = vpop.f32.mrf.mxu1 }
 0x396   : > { %v3507_v52 = vpop.f32.mrf.mxu0  ;;  %v1674_v59 = vsel %vm3940_vm5, %v3505_v51, -inf  ;;  %vm3953_vm5 = vmmov %vm3927_vm0 }
 0x397   : > { %v2562_v53 = vpop.f32.mrf.mxu1  ;;  %v1668_v48 = vsel %vm3938_vm6, %v3507_v52, -inf  ;;  %vm3951_vm6 = vmmov %vm3927_vm0 }
 0x398   : > { %1663 = vmax.xlane.f32.xlu0 %v1662_v16  ;;  %1666 = vmax.xlane.f32.xlu1 %v1665_v11  ;;  %v2556_v54 = vpop.f32.mrf.mxu0  ;;  %v2753_v11 = vld [vmem:[%s2908_s5 + $0x18] sm:$0xff] }
 0x399   : > { %v3511_v0 = vpop.f32.mrf.mxu1 }
 0x39a   : > { %v3513_v30 = vpop.f32.mrf.mxu0  ;;  %v1677_v60 = vsel %vm3927_vm0, %v3511_v0, -inf }
 0x39b   : > { %v1671_v19 = vsel %vm3939_vm4, %v3513_v30, -inf  ;;  %v2563_v57 = vpop.f32.mrf.mxu1  ;;  %vm3952_vm4 = vmmov %vm3927_vm0 }
 0x39c   : > { %1669 = vmax.xlane.f32.xlu0 %v1668_v48  ;;  %1672 = vmax.xlane.f32.xlu1 %v1671_v19  ;;  %v2557_v55 = vpop.f32.mrf.mxu0 }
 0x3a0   : > { %1675 = vmax.xlane.f32.xlu0 %v1674_v59  ;;  %1678 = vmax.xlane.f32.xlu1 %v1677_v60 }
 0x409   : > { %v1634_v61 = vpop.xlane.xlu0 %1633 }
 0x40a   : > { %v1680_v15 = vsub.f32 %v3459_v20, %v1634_v61 }
 0x40c   : > { %v1696_v4 = vmul.f32 1.442695, %v1680_v15 }
 0x40d   : > { %v1640_v6 = vpop.xlane.xlu0 %1639  ;;  %v1637_v10 = vpop.xlane.xlu1 %1636 }
 0x40e   : > { %2654 = vpow2.f32 %v1696_v4  ;;  %v1682_v32 = vsub.f32 %v3457_v37, %v1640_v6  ;;  %v1681_v3 = vsub.f32 %v3467_v33, %v1637_v10 }
 0x410   : > { %v1700_v7 = vmul.f32 1.442695, %v1682_v32  ;;  %v1698_v12 = vmul.f32 1.442695, %v1681_v3 }
 0x411   : > { %v1643_v13 = vpop.xlane.xlu0 %1642 }
 0x412   : > { %2656 = vpow2.f32 %v1700_v7  ;;  %v1683_v21 = vsub.f32 %v3465_v34, %v1643_v13 }
 0x413   : > { %2658 = vpow2.f32 %v1698_v12 }
 0x414   : > { %v1702_v28 = vmul.f32 1.442695, %v1683_v21 }
 0x415   : > { %v1646_v22 = vpop.xlane.xlu0 %1645  ;;  %v1649_v26 = vpop.xlane.xlu1 %1648 }
 0x416   : > { %2660 = vpow2.f32 %v1702_v28  ;;  %v1684_v23 = vsub.f32 %v3473_v29, %v1646_v22  ;;  %v1685_v43 = vsub.f32 %v3481_v31, %v1649_v26  ;;  %v2752_v31 = vld [vmem:[%s2908_s5 + $0x8] sm:$0xff]  ;;  %v2754_v28 = vld [vmem:[%s2908_s5 + $0x20] sm:$0xff] }
 0x418   : > { %v1704_v2 = vmul.f32 1.442695, %v1684_v23  ;;  %v1706_v24 = vmul.f32 1.442695, %v1685_v43 }
 0x419   : > { %v1652_v37 = vpop.xlane.xlu0 %1651  ;;  %v1655_v56 = vpop.xlane.xlu1 %1654 }
 0x41a   : > { %v1686_v46 = vsub.f32 %v3471_v40, %v1652_v37  ;;  %2662 = vpow2.f32 %v1704_v2  ;;  %v2751_v40 = vld [vmem:[%s2908_s5 + $0x10] sm:$0xff]  ;;  %v1687_v25 = vsub.f32 %v3479_v41, %v1655_v56  ;;  %v2757_v56 = vld [vmem:[%s2908_s5 + $0x38] sm:$0xff] }
 0x41b   : > { %v2655_v20 = vpop.eup %2654 }
 0x41c   : > { %v1728_v42 = vsel %vm3941_vm1, %v2655_v20, 0.0  ;;  %v1776_v36 = vmul.f32 %v2750_v35, %v2655_v20  ;;  %v1708_v45 = vmul.f32 1.442695, %v1686_v46  ;;  %v1710_v62 = vmul.f32 1.442695, %v1687_v25  ;;  %vm3954_vm1 = vmmov %vm3927_vm0 }
 0x41d   : > { %1729 = vadd.xlane.f32.xlu0 %v1728_v42  ;;  %v1658_v57 = vpop.xlane.xlu0 %1657  ;;  %v1661_v4 = vpop.xlane.xlu1 %1660 }
 0x41e   : > { %v1792_v1 = vsel %vm3944_vm12, %v1776_v36, 0.0  ;;  %2664 = vpow2.f32 %v1708_v45  ;;  %v1840_v50 = vmul.f32 %v2750_v35, %v1776_v36  ;;  %v1688_v15 = vsub.f32 %v3491_v17, %v1658_v57  ;;  %vm3957_vm12 = vmmov %vm3927_vm0 }
 0x41f   : > { %v2657_v33 = vpop.eup %2656  ;;  %2666 = vpow2.f32 %v1706_v24  ;;  %v1689_v17 = vsub.f32 %v3497_v49, %v1661_v4  ;;  %v2756_v49 = vld [vmem:[%s2908_s5 + $0x28] sm:$0xff]  ;;  %v2759_v4 = vld [vmem:[%s2908_s5 + $0x50] sm:$0xff] }
 0x420   : > { %v2659_v27 = vpop.eup %2658  ;;  %v1734_v34 = vsel %vm3942_vm10, %v2657_v33, 0.0  ;;  %v1778_v8 = vmul.f32 %v2751_v40, %v2657_v33  ;;  %v1856_v54 = vsel %vm3948_vm15, %v1840_v50, 0.0  ;;  %2668 = vpow2.f32 %v1710_v62  ;;  %vm3955_vm10 = vmmov %vm3927_vm0  ;;  %v2755_v33 = vld [vmem:[%s2908_s5 + $0x30] sm:$0xff] }
 0x421   : > { %1735 = vadd.xlane.f32.xlu0 %v1734_v34  ;;  %v1731_v29 = vsel %vm3943_vm11, %v2659_v27, 0.0  ;;  %v1777_v39 = vmul.f32 %v2752_v31, %v2659_v27  ;;  %v1664_v32 = vpop.xlane.xlu0 %1663  ;;  %v1712_v12 = vmul.f32 1.442695, %v1688_v15  ;;  %v1667_v26 = vpop.xlane.xlu1 %1666  ;;  %v1714_v2 = vmul.f32 1.442695, %v1689_v17  ;;  %vm3956_vm11 = vmmov %vm3927_vm0 }
 0x422   : > { %1732 = vadd.xlane.f32.xlu1 %v1731_v29  ;;  %v1798_v38 = vsel %vm3946_vm13, %v1778_v8, 0.0  ;;  %v1842_v48 = vmul.f32 %v2751_v40, %v1778_v8  ;;  %v1690_v13 = vsub.f32 %v3489_v9, %v1664_v32  ;;  %v1691_v27 = vsub.f32 %v3495_v18, %v1667_v26  ;;  %vm3959_vm13 = vmmov %vm3927_vm0 }
 0x423   : > { %v2661_v44 = vpop.eup %2660  ;;  %v1795_v16 = vsel %vm3947_vm8, %v1777_v39, 0.0  ;;  %v1841_v19 = vmul.f32 %v2752_v31, %v1777_v39  ;;  %2670 = vpow2.f32 %v1712_v12  ;;  %vm3960_vm8 = vmmov %vm3927_vm0 }
 0x424   : > { %v1737_v5 = vsel %vm3945_vm9, %v2661_v44, 0.0  ;;  %v1779_v53 = vmul.f32 %v2753_v11, %v2661_v44  ;;  %v1862_v59 = vsel %vm3950_vm14, %v1842_v48, 0.0  ;;  %v1716_v42 = vmul.f32 1.442695, %v1690_v13  ;;  %vm3958_vm9 = vmmov %vm3927_vm0 }
 0x425   : > { %1793 = vadd.xlane.f32.xlu0 %v1792_v1  ;;  %v1859_v60 = vsel %vm3951_vm6, %v1841_v19, 0.0  ;;  %v1718_v43 = vmul.f32 1.442695, %v1691_v27  ;;  %v1670_v40 = vpop.xlane.xlu0 %1669  ;;  %vm3961_vm15 = vmmov %vm3927_vm0  ;;  %v2758_v19 = vld [vmem:[%s2908_s5 + $0x40] sm:$0xff] }
 0x426   : > { %1738 = vadd.xlane.f32.xlu1 %v1737_v5  ;;  %v1801_v41 = vsel %vm3949_vm7, %v1779_v53, 0.0  ;;  %v1843_v61 = vmul.f32 %v2753_v11, %v1779_v53  ;;  %2672 = vpow2.f32 %v1716_v42  ;;  %vm3962_vm7 = vmmov %vm3927_vm0  ;;  %v1692_v39 = vsub.f32 %v3507_v52, %v1670_v40 }
 0x427   : > { %v2663_v55 = vpop.eup %2662  ;;  %2674 = vpow2.f32 %v1714_v2  ;;  %vm3963_vm14 = vmmov %vm3927_vm0 }
 0x428   : > { %v1740_v6 = vsel %vm3952_vm4, %v2663_v55, 0.0  ;;  %v1865_v3 = vsel %vm3953_vm5, %v1843_v61, 0.0  ;;  %v1780_v22 = vmul.f32 %v2754_v28, %v2663_v55  ;;  %2676 = vpow2.f32 %v1718_v43  ;;  %vm3964_vm6 = vmmov %vm3927_vm0 }
 0x429   : > { %1799 = vadd.xlane.f32.xlu0 %v1798_v38  ;;  %v1673_v38 = vpop.xlane.xlu1 %1672  ;;  %vm3965_vm4 = vmmov %vm3927_vm0 }
 0x42a   : > { %1796 = vadd.xlane.f32.xlu1 %v1795_v16  ;;  %v1804_v37 = vsel %vm3955_vm10, %v1780_v22, 0.0  ;;  %v1844_v36 = vmul.f32 %v2754_v28, %v1780_v22  ;;  %v1676_v16 = vpop.xlane.xlu0 %1675  ;;  %v1693_v52 = vsub.f32 %v3513_v30, %v1673_v38  ;;  %vm3966_vm5 = vmmov %vm3927_vm0  ;;  %v2760_v30 = vld [vmem:[%s2908_s5 + $0x48] sm:$0xff]  ;;  %v2761_v28 = vld [vmem:[%s2908_s5 + $0x58] sm:$0xff] }
 0x42b   : > { %v2665_v10 = vpop.eup %2664  ;;  %v1694_v48 = vsub.f32 %v3505_v51, %v1676_v16  ;;  %vm3968_vm10 = vmmov %vm3927_vm0 }
 0x42c   : > { %v2667_v7 = vpop.eup %2666  ;;  %v1746_v21 = vsel %vm3927_vm0, %v2665_v10, 0.0  ;;  %v1782_v9 = vmul.f32 %v2755_v33, %v2665_v10  ;;  %v1868_v18 = vsel %vm3959_vm13, %v1844_v36, 0.0  ;;  %vm3972_vm13 = vmmov %vm3927_vm0 }
 0x42d   : > { %1857 = vadd.xlane.f32.xlu0 %v1856_v54  ;;  %v1743_v20 = vsel %vm3954_vm1, %v2667_v7, 0.0  ;;  %v2669_v23 = vpop.eup %2668  ;;  %v1781_v34 = vmul.f32 %v2756_v49, %v2667_v7  ;;  %v1720_v54 = vmul.f32 1.442695, %v1692_v39  ;;  %v1724_v61 = vmul.f32 1.442695, %v1694_v48  ;;  %vm3967_vm1 = vmmov %vm3927_vm0 }
 0x42e   : > { %1802 = vadd.xlane.f32.xlu1 %v1801_v41  ;;  %v1749_v46 = vsel %vm3956_vm11, %v2669_v23, 0.0  ;;  %v1810_v35 = vsel %vm3957_vm12, %v1782_v9, 0.0  ;;  %v1783_v44 = vmul.f32 %v2757_v56, %v2669_v23  ;;  %v1846_v45 = vmul.f32 %v2755_v33, %v1782_v9  ;;  %vm3969_vm11 = vmmov %vm3927_vm0 }
 0x42f   : > { %v1807_v29 = vsel %vm3958_vm9, %v1781_v34, 0.0  ;;  %v1845_v5 = vmul.f32 %v2756_v49, %v1781_v34  ;;  %2678 = vpow2.f32 %v1720_v54  ;;  %vm3970_vm12 = vmmov %vm3927_vm0  ;;  %v2762_v34 = vld [vmem:[%s2908_s5 + $0x60] sm:$0xff] }
 0x430   : > { %v1813_v1 = vsel %vm3960_vm8, %v1783_v44, 0.0  ;;  %v1874_v8 = vsel %vm3961_vm15, %v1846_v45, 0.0  ;;  %v2671_v24 = vpop.eup %2670  ;;  %v1847_v31 = vmul.f32 %v2757_v56, %v1783_v44  ;;  %2680 = vpow2.f32 %v1724_v61  ;;  %vm3971_vm9 = vmmov %vm3927_vm0  ;;  %v2763_v56 = vld [vmem:[%s2908_s5 + $0x70] sm:$0xff]  ;;  %v2764_v45 = vld [vmem:[%s2908_s5 + $0x68] sm:$0xff] }
 0x431   : > { %1863 = vadd.xlane.f32.xlu0 %v1862_v59  ;;  %v1871_v25 = vsel %vm3962_vm7, %v1845_v5, 0.0  ;;  %v1752_v50 = vsel %vm3963_vm14, %v2671_v24, 0.0  ;;  %v1784_v57 = vmul.f32 %v2758_v19, %v2671_v24  ;;  %vm3973_vm8 = vmmov %vm3927_vm0  ;;  %v2765_v24 = vld [vmem:[%s2908_s5 + $0x78] sm:$0xff]  ;;  %s3773_s5 = scalar_lea.vmem [#allocation2], %s2387_s30 }
 0x432   : > { %1860 = vadd.xlane.f32.xlu1 %v1859_v60  ;;  %v1877_v11 = vsel %vm3964_vm6, %v1847_v31, 0.0  ;;  %v1679_v60 = vpop.xlane.xlu1 %1678  ;;  %vm3974_vm15 = vmmov %vm3927_vm0  ;;  %s2324_s7 = sshll.u32 %s3773_s5, 4  ;;  %s2325_s7 = int_to_ptr.vmem [resolvable:$true] %s2324_s7 }
 0x433   : > { %v2673_v62 = vpop.eup %2672  ;;  %v1816_v15 = vsel %vm3927_vm0, %v1784_v57, 0.0  ;;  %v1695_v10 = vsub.f32 %v3511_v0, %v1679_v60  ;;  %v1848_v12 = vmul.f32 %v2758_v19, %v1784_v57  ;;  %vm3975_vm7 = vmmov %vm3927_vm0  ;;  %s2766_s11 = scalar_lea.vmem %s2325_s7, 128  ;;  %p2773_p0 = scmp.lt.s32.totalorder %s2325_s7, %s2771_s13 }
 0x434   : > { %v2675_v53 = vpop.eup %2674  ;;  %v1758_v41 = vsel %vm3965_vm4, %v2673_v62, 0.0  ;;  %v1786_v51 = vmul.f32 %v2759_v4, %v2673_v62  ;;  %vm3976_vm14 = vmmov %vm3927_vm0  ;;  %p2767_p11 = scmp.ne.s32.totalorder %s2325_s7, %s2766_s11  ;;  %p2774_p1 = scmp.lt.s32.totalorder %s2772_s14, %s2766_s11 }
 0x435   : > { %1741 = vadd.xlane.f32.xlu0 %v1740_v6  ;;  %v1755_v55 = vsel %vm3966_vm5, %v2675_v53, 0.0  ;;  %v2677_v59 = vpop.eup %2676  ;;  %v1722_v6 = vmul.f32 1.442695, %v1693_v52  ;;  %v1726_v13 = vmul.f32 1.442695, %v1695_v10  ;;  %v1880_v0 = vsel %vm3970_vm12, %v1848_v12, 0.0  ;;  %vm3977_vm6 = vmmov %vm3927_vm0 }
 0x436   : > { %1866 = vadd.xlane.f32.xlu1 %v1865_v3  ;;  %v1761_v32 = vsel %vm3967_vm1, %v2677_v59, 0.0  ;;  %v1785_v3 = vmul.f32 %v2760_v30, %v2675_v53  ;;  %v1822_v7 = vsel %vm3968_vm10, %v1786_v51, 0.0  ;;  %v1787_v22 = vmul.f32 %v2761_v28, %v2677_v59  ;;  %vm3978_vm4 = vmmov %vm3927_vm0  ;;  %p2768_p12 = pnand %p2767_p11, %p2894_p5  ;;  %p2775_p2 = por %p2774_p1, %p2773_p0 }
 0x437   : > { %2682 = vpow2.f32 %v1722_v6  ;;  %v1850_v17 = vmul.f32 %v2759_v4, %v1786_v51  ;;  %vm3979_vm5 = vmmov %vm3927_vm0 }
 0x438   : > { %2684 = vpow2.f32 %v1726_v13  ;;  %v1849_v23 = vmul.f32 %v2760_v30, %v1785_v3  ;;  %v1851_v33 = vmul.f32 %v2761_v28, %v1787_v22  ;;  %vm3980_vm1 = vmmov %vm3927_vm0  ;;  %p2769_p13 = pneg %p2768_p12 }
 0x439   : > { %1747 = vadd.xlane.f32.xlu0 %v1746_v21  ;;  %v1819_v21 = vsel %vm3969_vm11, %v1785_v3, 0.0  ;;  %v1886_v26 = vsel %vm3972_vm13, %v1850_v17, 0.0  ;;  %vm3981_vm10 = vmmov %vm3927_vm0 }
 0x43a   : > { %1744 = vadd.xlane.f32.xlu1 %v1743_v20  ;;  %v1825_v20 = vsel %vm3971_vm9, %v1787_v22, 0.0  ;;  %v1889_v27 = vsel %vm3975_vm7, %v1851_v33, 0.0  ;;  %vm3982_vm11 = vmmov %vm3927_vm0  ;;  %p2776_p3 = pnand %p2775_p2, %p2769_p13 }
 0x43b   : > { %vm3983_vm12 = vmmov %vm3927_vm0 }
 0x43c   : > { %v2679_v42 = vpop.eup %2678  ;;  %vm3984_vm9 = vmmov %vm3927_vm0 }
 0x43d   : > { %1805 = vadd.xlane.f32.xlu0 %v1804_v37  ;;  %v1883_v37 = vsel %vm3973_vm8, %v1849_v23, 0.0  ;;  %v1764_v9 = vsel %vm3974_vm15, %v2679_v42, 0.0  ;;  %v2681_v2 = vpop.eup %2680  ;;  %vm3985_vm13 = vmmov %vm3927_vm0 }
 0x43e   : > { %1750 = vadd.xlane.f32.xlu1 %v1749_v46  ;;  %v1770_v49 = vsel %vm3976_vm14, %v2681_v2, 0.0  ;;  %v1790_v44 = vmul.f32 %v2763_v56, %v2681_v2 }
 0x440   : > { %v1834_v5 = vsel %vm3927_vm0, %v1790_v44, 0.0  ;;  %v1854_v39 = vmul.f32 %v2763_v56, %v1790_v44 }
 0x441   : > { %1811 = vadd.xlane.f32.xlu0 %v1810_v35  ;;  %v1788_v35 = vmul.f32 %v2762_v34, %v2679_v42 }
 0x442   : > { %1808 = vadd.xlane.f32.xlu1 %v1807_v29  ;;  %v1898_v62 = vsel %vm3983_vm12, %v1854_v39, 0.0 }
 0x443   : > { %v1828_v29 = vsel %vm3978_vm4, %v1788_v35, 0.0  ;;  %v1852_v40 = vmul.f32 %v2762_v34, %v1788_v35  ;;  %vm2235_vm4 = vcmask 261312  }
 0x444   : > { %v2683_v46 = vpop.eup %2682 }
 0x445   : > { %1869 = vadd.xlane.f32.xlu0 %v1868_v18  ;;  %v1767_v36 = vsel %vm3977_vm6, %v2683_v46, 0.0  ;;  %v2685_v43 = vpop.eup %2684  ;;  %v1892_v31 = vsel %vm3981_vm10, %v1852_v40, 0.0 }
 0x446   : > { %1814 = vadd.xlane.f32.xlu1 %v1813_v1  ;;  %v1773_v18 = vsel %vm3979_vm5, %v2685_v43, 0.0  ;;  %v1789_v1 = vmul.f32 %v2764_v45, %v2683_v46 }
 0x449   : > { %1875 = vadd.xlane.f32.xlu0 %v1874_v8  ;;  %v1831_v8 = vsel %vm3980_vm1, %v1789_v1, 0.0 }
 0x44a   : > { %1872 = vadd.xlane.f32.xlu1 %v1871_v25  ;;  %v1791_v25 = vmul.f32 %v2765_v24, %v2685_v43 }
 0x44c   : > { %v1837_v38 = vsel %vm3982_vm11, %v1791_v25, 0.0  ;;  %vm3987_vm11 = vcmask 1043459  }
 0x44d   : > { %1753 = vadd.xlane.f32.xlu0 %v1752_v50  ;;  %v1853_v50 = vmul.f32 %v2764_v45, %v1789_v1 }
 0x44e   : > { %1878 = vadd.xlane.f32.xlu1 %v1877_v11  ;;  %v1855_v11 = vmul.f32 %v2765_v24, %v1791_v25  ;;  %v2230_v25 = vadd.s32 4294967272, %v3014_v47 }
 0x44f   : > { %v1895_v16 = vsel %vm3984_vm9, %v1853_v50, 0.0 }
 0x450   : > { %v1901_v53 = vsel %vm3985_vm13, %v1855_v11, 0.0  ;;  %vm3988_vm13 = vcmask 1044484  }
 0x451   : > { %1759 = vadd.xlane.f32.xlu0 %v1758_v41 }
 0x452   : > { %1756 = vadd.xlane.f32.xlu1 %v1755_v55 }
 0x455   : > { %1817 = vadd.xlane.f32.xlu0 %v1816_v15 }
 0x456   : > { %1762 = vadd.xlane.f32.xlu1 %v1761_v32 }
 0x459   : > { %1823 = vadd.xlane.f32.xlu0 %v1822_v7 }
 0x45a   : > { %1820 = vadd.xlane.f32.xlu1 %v1819_v21 }
 0x45d   : > { %1881 = vadd.xlane.f32.xlu0 %v1880_v0 }
 0x45e   : > { %1826 = vadd.xlane.f32.xlu1 %v1825_v20 }
 0x461   : > { %1887 = vadd.xlane.f32.xlu0 %v1886_v26 }
 0x462   : > { %1884 = vadd.xlane.f32.xlu1 %v1883_v37 }
 0x465   : > { %1765 = vadd.xlane.f32.xlu0 %v1764_v9 }
 0x466   : > { %1890 = vadd.xlane.f32.xlu1 %v1889_v27 }
 0x469   : > { %1771 = vadd.xlane.f32.xlu0 %v1770_v49 }
 0x46a   : > { %1768 = vadd.xlane.f32.xlu1 %v1767_v36 }
 0x46d   : > { %1829 = vadd.xlane.f32.xlu0 %v1828_v29 }
 0x46e   : > { %1774 = vadd.xlane.f32.xlu1 %v1773_v18 }
 0x471   : > { %1835 = vadd.xlane.f32.xlu0 %v1834_v5 }
 0x472   : > { %1832 = vadd.xlane.f32.xlu1 %v1831_v8 }
 0x475   : > { %1893 = vadd.xlane.f32.xlu0 %v1892_v31 }
 0x476   : > { %1838 = vadd.xlane.f32.xlu1 %v1837_v38 }
 0x479   : > { %1899 = vadd.xlane.f32.xlu0 %v1898_v62 }
 0x47a   : > { %1896 = vadd.xlane.f32.xlu1 %v1895_v16  ;;  %v2225_v16 = vadd.s32 4294967280, %v3014_v47 }
 0x47e   : > { %1902 = vadd.xlane.f32.xlu1 %v1901_v53  ;;  %v3628_v53 = vsub.s32 %v2230_v25, %v3024_v58 }
 0x4a6   : > { %v1730_v54 = vpop.xlane.xlu0 %1729 }
 0x4a7   : > { %2686 = vrcp.f32 %v1730_v54 }
 0x4aa   : > { %v1736_v48 = vpop.xlane.xlu0 %1735 }
 0x4ab   : > { %2688 = vrcp.f32 %v1736_v48  ;;  %v1733_v41 = vpop.xlane.xlu1 %1732 }
 0x4ac   : > { %2690 = vrcp.f32 %v1733_v41 }
 0x4ae   : > { %v1794_v19 = vpop.xlane.xlu0 %1793 }
 0x4af   : > { %v1739_v57 = vpop.xlane.xlu1 %1738 }
 0x4b0   : > { %2692 = vrcp.f32 %v1739_v57 }
 0x4b2   : > { %v1800_v52 = vpop.xlane.xlu0 %1799 }
 0x4b3   : > { %v1797_v55 = vpop.xlane.xlu1 %1796 }
 0x4b4   : > { %v2687_v59 = vpop.eup %2686 }
 0x4b5   : > { %v1920_v60 = vmul.f32 %v2687_v59, %v1794_v19 }
 0x4b6   : > { %v1858_v61 = vpop.xlane.xlu0 %1857 }
 0x4b7   : > { %v1952_v15 = vmul.f32 %v1920_v60, %v1920_v60  ;;  %v1936_v4 = vmul.f32 %v2687_v59, %v1858_v61  ;;  %v1803_v51 = vpop.xlane.xlu1 %1802  ;;  %v2131_v22 = vrot.slane %v1920_v60, %v3035_v14 }
 0x4b8   : > { %v2689_v6 = vpop.eup %2688 }
 0x4b9   : > { %v2691_v10 = vpop.eup %2690  ;;  %v1922_v32 = vmul.f32 %v2689_v6, %v1800_v52  ;;  %v1968_v30 = vsub.f32 %v1936_v4, %v1952_v15 }
 0x4ba   : > { %v1921_v3 = vmul.f32 %v2691_v10, %v1797_v55  ;;  %v1864_v7 = vpop.xlane.xlu0 %1863  ;;  %v3635_v55 = vsub.s32 %v2225_v16, %v3024_v58 }
 0x4bb   : > { %v1954_v12 = vmul.f32 %v1922_v32, %v1922_v32  ;;  %v3601_v13 = vmax.f32 %v1968_v30, 0.0001  ;;  %v1938_v21 = vmul.f32 %v2689_v6, %v1864_v7  ;;  %v1861_v28 = vpop.xlane.xlu1 %1860  ;;  %v2140_v2 = vrot.slane %v1922_v32, %v3035_v14 }
 0x4bc   : > { %v1953_v0 = vmul.f32 %v1921_v3, %v1921_v3  ;;  %v2135_v17 = vrot.slane %v1921_v3, %v3030_v63  ;;  %v1937_v20 = vmul.f32 %v2691_v10, %v1861_v28 }
 0x4bd   : > { %v2693_v23 = vpop.eup %2692  ;;  %2694 = vrsqrt.f32 %v3601_v13  ;;  %v1970_v37 = vsub.f32 %v1938_v21, %v1954_v12  ;;  %vm2002_vm8 = vcmp.eq.f32.partialorder %v3601_v13, inf  ;;  %v2005_v41 = vand.u32 2147483648, %v3601_v13 }
 0x4be   : > { %v2136_v26 = vsel %vm549_vm2, %v2135_v17, %v2131_v22  ;;  %v1923_v42 = vmul.f32 %v2693_v23, %v1803_v51  ;;  %v1969_v33 = vsub.f32 %v1937_v20, %v1953_v0  ;;  %v1742_v9 = vpop.xlane.xlu0 %1741  ;;  %vm2004_vm6 = vcmp.eq.f32.partialorder %v3601_v13, 0.0 }
 0x4bf   : > { %v1867_v27 = vpop.xlane.xlu1 %1866  ;;  %v1986_v34 = vmax.f32 %v1970_v37, 0.0001 }
 0x4c0   : > { %v1955_v46 = vmul.f32 %v1923_v42, %v1923_v42  ;;  %v2144_v49 = vrot.slane %v1923_v42, %v3030_v63  ;;  %v1985_v35 = vmax.f32 %v1969_v33, 0.0001  ;;  %v1939_v36 = vmul.f32 %v2693_v23, %v1867_v27 }
 0x4c1   : > { %2696 = vrsqrt.f32 %v1986_v34  ;;  %vm2016_vm7 = vcmp.eq.f32.partialorder %v1986_v34, inf  ;;  %v2019_v4 = vand.u32 2147483648, %v1986_v34  ;;  %vm2018_vm5 = vcmp.eq.f32.partialorder %v1986_v34, 0.0 }
 0x4c2   : > { %v2145_v43 = vsel %vm549_vm2, %v2144_v49, %v2140_v2  ;;  %v1748_v29 = vpop.xlane.xlu0 %1747  ;;  %2698 = vrsqrt.f32 %v1985_v35  ;;  %v1971_v18 = vsub.f32 %v1939_v36, %v1955_v46  ;;  %vm2009_vm15 = vcmp.eq.f32.partialorder %v1985_v35, inf }
 0x4c3   : > { %v3611_v56 = vsel %vm614_vm3, %v2145_v43, %v2136_v26  ;;  %v1745_v44 = vpop.xlane.xlu1 %1744  ;;  %v2012_v19 = vand.u32 2147483648, %v1985_v35  ;;  %vm2011_vm14 = vcmp.eq.f32.partialorder %v1985_v35, 0.0 }
 0x4c4   : > { %v1987_v45 = vmax.f32 %v1971_v18, 0.0001 }
 0x4c6   : > { %v3613_v1 = vpop.xlane.xlu0 %1805  ;;  %2700 = vrsqrt.f32 %v1987_v45  ;;  %vm2023_vm0 = vcmp.eq.f32.partialorder %v1987_v45, inf  ;;  %v2026_v30 = vand.u32 2147483648, %v1987_v45  ;;  %vm2025_vm1 = vcmp.eq.f32.partialorder %v1987_v45, 0.0 }
 0x4c7   : > { %v1751_v5 = vpop.xlane.xlu1 %1750  ;;  %2702 = vrcp.f32 %v1742_v9 }
 0x4c8   : > { %2704 = vrcp.f32 %v1745_v44 }
 0x4c9   : > { %2706 = vrcp.f32 %v1748_v29 }
 0x4ca   : > { %v2695_v40 = vpop.eup %2694  ;;  %v3615_v8 = vpop.xlane.xlu0 %1811  ;;  %2708 = vrcp.f32 %v1751_v5 }
 0x4cb   : > { %v3617_v24 = vpop.xlane.xlu1 %1808  ;;  %v2001_v31 = vmul.f32 %v2695_v40, %v3601_v13 }
 0x4cd   : > { %v2003_v48 = vsel %vm2002_vm8, %v3601_v13, %v2001_v31  ;;  %vm3989_vm8 = vcmask 1045509  }
 0x4ce   : > { %v3621_v39 = vpop.xlane.xlu0 %1869  ;;  %v2697_v38 = vpop.eup %2696  ;;  %v2006_v15 = vsel %vm2004_vm6, %v2005_v41, %v2003_v48 }
 0x4cf   : > { %v3623_v50 = vpop.xlane.xlu1 %1814  ;;  %v2699_v62 = vpop.eup %2698  ;;  %v2015_v11 = vmul.f32 %v2697_v38, %v1986_v34  ;;  %v2229_v3 = vrot.slane %v2006_v15, %v3635_v55 }
 0x4d0   : > { %v2008_v54 = vmul.f32 %v2699_v62, %v1985_v35 }
 0x4d1   : > { %v2017_v59 = vsel %vm2016_vm7, %v1986_v34, %v2015_v11  ;;  %vm3991_vm7 = vcmask 1047559  }
 0x4d2   : > { %v3632_v57 = vpop.xlane.xlu0 %1875  ;;  %v2010_v52 = vsel %vm2009_vm15, %v1985_v35, %v2008_v54  ;;  %v2020_v32 = vsel %vm2018_vm5, %v2019_v4, %v2017_v59  ;;  %vm3990_vm15 = vcmask 1046534  }
 0x4d3   : > { %v1873_v47 = vpop.xlane.xlu1 %1872  ;;  %v2013_v60 = vsel %vm2011_vm14, %v2012_v19, %v2010_v52  ;;  %v2701_v61 = vpop.eup %2700  ;;  %v2240_v13 = vrot.slane %v2020_v32, %v3635_v55 }
 0x4d4   : > { %v2234_v51 = vrot.slane %v2013_v60, %v3628_v53  ;;  %v2022_v6 = vmul.f32 %v2701_v61, %v1987_v45  ;;  %v2703_v42 = vpop.eup %2702 }
 0x4d5   : > { %v2705_v33 = vpop.eup %2704  ;;  %v3648_v9 = vmul.f32 %v2703_v42, %v3613_v1  ;;  %v1940_v43 = vmul.f32 %v2703_v42, %v3621_v39 }
 0x4d6   : > { %v1754_v10 = vpop.xlane.xlu0 %1753  ;;  %v2024_v7 = vsel %vm2023_vm0, %v1987_v45, %v2022_v6  ;;  %v2236_v22 = vsel %vm2235_vm4, %v2234_v51, %v2229_v3  ;;  %v2707_v27 = vpop.eup %2706  ;;  %v3651_v46 = vmul.f32 %v2705_v33, %v3617_v24  ;;  %v1941_v1 = vmul.f32 %v2705_v33, %v1873_v47 }
 0x4d7   : > { %v1879_v58 = vpop.xlane.xlu1 %1878  ;;  %v2027_v12 = vsel %vm2025_vm1, %v2026_v30, %v2024_v7  ;;  %2710 = vrcp.f32 %v1754_v10  ;;  %v2709_v34 = vpop.eup %2708  ;;  %v1956_v35 = vmul.f32 %v3648_v9, %v3648_v9  ;;  %v3656_v36 = vmul.f32 %v2707_v27, %v3615_v8 }
 0x4d8   : > { %v2244_v21 = vrot.slane %v2027_v12, %v3628_v53  ;;  %v1957_v18 = vmul.f32 %v3651_v46, %v3651_v46  ;;  %v3662_v45 = vmul.f32 %v2709_v34, %v3623_v50  ;;  %v1942_v8 = vmul.f32 %v2707_v27, %v3632_v57 }
 0x4d9   : > { %v1958_v24 = vmul.f32 %v3656_v36, %v3656_v36  ;;  %v1972_v25 = vsub.f32 %v1940_v43, %v1956_v35  ;;  %v1943_v50 = vmul.f32 %v2709_v34, %v1879_v58 }
 0x4da   : > { %v1760_v28 = vpop.xlane.xlu0 %1759  ;;  %v2245_v17 = vsel %vm2235_vm4, %v2244_v21, %v2240_v13  ;;  %v1959_v16 = vmul.f32 %v3662_v45, %v3662_v45  ;;  %v1973_v11 = vsub.f32 %v1941_v1, %v1957_v18  ;;  %v2162_v42 = vrot.slane %v3662_v45, %v3030_v63 }
 0x4db   : > { %v1757_v0 = vpop.xlane.xlu1 %1756  ;;  %2712 = vrcp.f32 %v1760_v28  ;;  %v3645_v26 = vsel %vm614_vm3, %v2245_v17, %v2236_v22  ;;  %v3673_v41 = vmax.f32 %v1972_v25, 0.0001  ;;  %v1974_v19 = vsub.f32 %v1942_v8, %v1958_v24 }
 0x4dc   : > { %2714 = vrcp.f32 %v1757_v0  ;;  %v3681_v61 = vmax.f32 %v1973_v11, 0.0001  ;;  %v1975_v15 = vsub.f32 %v1943_v50, %v1959_v16  ;;  %v2153_v17 = vrot.slane %v3651_v46, %v3030_v63 }
 0x4dd   : > { %v3686_v10 = vmax.f32 %v1974_v19, 0.0001  ;;  %v2158_v46 = vrot.slane %v3656_v36, %v3035_v14  ;;  %vm3986_vm3 = vcmask 1042434   ;;  %vm2030_vm10 = vcmp.eq.f32.partialorder %v3673_v41, inf }
 0x4de   : > { %v1818_v20 = vpop.xlane.xlu0 %1817  ;;  %v3693_v13 = vmax.f32 %v1975_v15, 0.0001  ;;  %vm2037_vm12 = vcmp.eq.f32.partialorder %v3681_v61, inf  ;;  %vm2032_vm9 = vcmp.eq.f32.partialorder %v3673_v41, 0.0  ;;  %vm2039_vm6 = vcmp.eq.f32.partialorder %v3681_v61, 0.0 }
 0x4df   : > { %v1763_v23 = vpop.xlane.xlu1 %1762  ;;  %vm2044_vm14 = vcmp.eq.f32.partialorder %v3686_v10, inf  ;;  %vm2046_vm0 = vcmp.eq.f32.partialorder %v3686_v10, 0.0 }
 0x4e0   : > { %2716 = vrcp.f32 %v1763_v23  ;;  %vm2051_vm5 = vcmp.eq.f32.partialorder %v3693_v13, inf  ;;  %vm2053_vm1 = vcmp.eq.f32.partialorder %v3693_v13, 0.0 }
 0x4e2   : > { %v1824_v37 = vpop.xlane.xlu0 %1823 }
 0x4e3   : > { %v1821_v2 = vpop.xlane.xlu1 %1820 }
 0x4e4   : > { %v2711_v44 = vpop.eup %2710 }
 0x4e5   : > { %v3667_v39 = vmul.f32 %v2711_v44, %v1818_v20 }
 0x4e6   : > { %v1882_v49 = vpop.xlane.xlu0 %1881 }
 0x4e7   : > { %v1827_v29 = vpop.xlane.xlu1 %1826  ;;  %v1960_v57 = vmul.f32 %v3667_v39, %v3667_v39  ;;  %v1944_v59 = vmul.f32 %v2711_v44, %v1882_v49 }
 0x4e8   : > { %v2713_v40 = vpop.eup %2712 }
 0x4e9   : > { %v2715_v38 = vpop.eup %2714  ;;  %v3671_v54 = vmul.f32 %v2713_v40, %v1824_v37  ;;  %v1976_v3 = vsub.f32 %v1944_v59, %v1960_v57 }
 0x4ea   : > { %v1888_v5 = vpop.xlane.xlu0 %1887  ;;  %v3675_v52 = vmul.f32 %v2715_v38, %v1821_v2  ;;  %v2149_v2 = vrot.slane %v3648_v9, %v3035_v14 }
 0x4eb   : > { %v1885_v31 = vpop.xlane.xlu1 %1884  ;;  %v1962_v4 = vmul.f32 %v3671_v54, %v3671_v54  ;;  %v1946_v51 = vmul.f32 %v2713_v40, %v1888_v5  ;;  %v3698_v20 = vmax.f32 %v1976_v3, 0.0001  ;;  %v2033_v5 = vand.u32 2147483648, %v3673_v41 }
 0x4ec   : > { %v1961_v32 = vmul.f32 %v3675_v52, %v3675_v52  ;;  %v1945_v30 = vmul.f32 %v2715_v38, %v1885_v31  ;;  %v2154_v34 = vsel %vm549_vm2, %v2153_v17, %v2149_v2  ;;  %v2171_v40 = vrot.slane %v3675_v52, %v3030_v63 }
 0x4ed   : > { %v2717_v62 = vpop.eup %2716  ;;  %v1978_v21 = vsub.f32 %v1946_v51, %v1962_v4  ;;  %v2201_v36 = vsel %vm3986_vm3, %v2154_v34, %v3611_v56  ;;  %v2040_v38 = vand.u32 2147483648, %v3681_v61  ;;  %v2167_v56 = vrot.slane %v3667_v39, %v3035_v14 }
 0x4ee   : > { %v1766_v48 = vpop.xlane.xlu0 %1765  ;;  %v3679_v60 = vmul.f32 %v2717_v62, %v1827_v29  ;;  %v1977_v22 = vsub.f32 %v1945_v30, %v1961_v32  ;;  %v2163_v29 = vsel %vm549_vm2, %v2162_v42, %v2158_v46  ;;  %v2176_v39 = vrot.slane %v3671_v54, %v3035_v14 }
 0x4ef   : > { %v1891_v47 = vpop.xlane.xlu1 %1890  ;;  %2718 = vrcp.f32 %v1766_v48  ;;  %v3703_v37 = vmax.f32 %v1978_v21, 0.0001  ;;  %v2202_v25 = vsel %vm3987_vm11, %v2163_v29, %v2201_v36  ;;  %v2172_v15 = vsel %vm549_vm2, %v2171_v40, %v2167_v56 }
 0x4f0   : > { %2720 = vrsqrt.f32 %v3673_v41  ;;  %v1963_v7 = vmul.f32 %v3679_v60, %v3679_v60  ;;  %v1947_v12 = vmul.f32 %v2717_v62, %v1891_v47  ;;  %v3707_v27 = vmax.f32 %v1977_v22, 0.0001 }
 0x4f1   : > { %v2180_v62 = vrot.slane %v3679_v60, %v3030_v63  ;;  %vm2058_vm3 = vcmp.eq.f32.partialorder %v3698_v20, inf  ;;  %vm2072_vm11 = vcmp.eq.f32.partialorder %v3703_v37, inf }
 0x4f2   : > { %v1772_v6 = vpop.xlane.xlu0 %1771  ;;  %v1979_v23 = vsub.f32 %v1947_v12, %v1963_v7 }
 0x4f3   : > { %v1769_v58 = vpop.xlane.xlu1 %1768  ;;  %2722 = vrcp.f32 %v1772_v6  ;;  %v2181_v7 = vsel %vm549_vm2, %v2180_v62, %v2176_v39  ;;  %v2054_v62 = vand.u32 2147483648, %v3693_v13 }
 0x4f4   : > { %2724 = vrcp.f32 %v1769_v58  ;;  %v3713_v35 = vmax.f32 %v1979_v23, 0.0001  ;;  %v2203_v23 = vsel %vm3988_vm13, %v2172_v15, %v2202_v25  ;;  %v2068_v15 = vand.u32 2147483648, %v3707_v27 }
 0x4f5   : > { %2726 = vrsqrt.f32 %v3681_v61 }
 0x4f6   : > { %v1830_v28 = vpop.xlane.xlu0 %1829  ;;  %2728 = vrsqrt.f32 %v3686_v10  ;;  %vm2079_vm13 = vcmp.eq.f32.partialorder %v3713_v35, inf }
 0x4f7   : > { %v1775_v0 = vpop.xlane.xlu1 %1774 }
 0x4f8   : > { %2730 = vrcp.f32 %v1775_v0 }
 0x4f9   : > { %2732 = vrsqrt.f32 %v3693_v13 }
 0x4fa   : > { %v1836_v33 = vpop.xlane.xlu0 %1835  ;;  %2734 = vrsqrt.f32 %v3698_v20 }
 0x4fb   : > { %v1833_v49 = vpop.xlane.xlu1 %1832  ;;  %2736 = vrsqrt.f32 %v3703_v37 }
 0x4fc   : > { %v2719_v43 = vpop.eup %2718  ;;  %2738 = vrsqrt.f32 %v3707_v27 }
 0x4fd   : > { %v1932_v9 = vmul.f32 %v2719_v43, %v1830_v28  ;;  %v2721_v1 = vpop.eup %2720  ;;  %2740 = vrsqrt.f32 %v3713_v35 }
 0x4fe   : > { %v1894_v44 = vpop.xlane.xlu0 %1893  ;;  %v2029_v48 = vmul.f32 %v2721_v1, %v3673_v41 }
 0x4ff   : > { %v1948_v18 = vmul.f32 %v2719_v43, %v1894_v44  ;;  %v1839_v45 = vpop.xlane.xlu1 %1838  ;;  %v1964_v8 = vmul.f32 %v1932_v9, %v1932_v9  ;;  %v2185_v60 = vrot.slane %v1932_v9, %v3035_v14 }
 0x500   : > { %v2723_v24 = vpop.eup %2722  ;;  %v2031_v28 = vsel %vm2030_vm10, %v3673_v41, %v2029_v48  ;;  %vm2060_vm10 = vcmp.eq.f32.partialorder %v3698_v20, 0.0 }
 0x501   : > { %v2725_v31 = vpop.eup %2724  ;;  %v1934_v16 = vmul.f32 %v2723_v24, %v1836_v33  ;;  %v1980_v52 = vsub.f32 %v1948_v18, %v1964_v8 }
 0x502   : > { %v1900_v11 = vpop.xlane.xlu0 %1899  ;;  %v2727_v50 = vpop.eup %2726  ;;  %v1933_v19 = vmul.f32 %v2725_v31, %v1833_v49  ;;  %v2204_v49 = vsel %vm3989_vm8, %v2181_v7, %v2203_v23  ;;  %vm2067_vm8 = vcmp.eq.f32.partialorder %v3707_v27, 0.0 }
 0x503   : > { %v1950_v47 = vmul.f32 %v2723_v24, %v1900_v11  ;;  %v1897_v57 = vpop.xlane.xlu1 %1896  ;;  %v2729_v59 = vpop.eup %2728  ;;  %v1966_v4 = vmul.f32 %v1934_v16, %v1934_v16  ;;  %v3740_v30 = vmax.f32 %v1980_v52, 0.0001  ;;  %v2036_v3 = vmul.f32 %v2727_v50, %v3681_v61 }
 0x504   : > { %v1965_v6 = vmul.f32 %v1933_v19, %v1933_v19  ;;  %v2189_v32 = vrot.slane %v1933_v19, %v3030_v63  ;;  %v1949_v58 = vmul.f32 %v2725_v31, %v1897_v57  ;;  %v2043_v22 = vmul.f32 %v2729_v59, %v3686_v10 }
 0x505   : > { %v2731_v51 = vpop.eup %2730  ;;  %v1982_v21 = vsub.f32 %v1950_v47, %v1966_v4  ;;  %2742 = vrsqrt.f32 %v3740_v30  ;;  %v2194_v42 = vrot.slane %v1934_v16, %v3035_v14  ;;  %v2038_v44 = vsel %vm2037_vm12, %v3681_v61, %v2036_v3 }
 0x506   : > { %v1935_v12 = vmul.f32 %v2731_v51, %v1839_v45  ;;  %v2733_v54 = vpop.eup %2732  ;;  %v2190_v0 = vsel %vm549_vm2, %v2189_v32, %v2185_v60  ;;  %v1981_v34 = vsub.f32 %v1949_v58, %v1965_v6  ;;  %v2034_v24 = vsel %vm2032_vm9, %v2033_v5, %v2031_v28 }
 0x507   : > { %v1903_v17 = vpop.xlane.xlu1 %1902  ;;  %v3756_v46 = vmax.f32 %v1982_v21, 0.0001  ;;  %v2735_v29 = vpop.eup %2734  ;;  %v2050_v9 = vmul.f32 %v2733_v54, %v3693_v13  ;;  %v2205_v18 = vsel %vm3990_vm15, %v2190_v0, %v2204_v49  ;;  %v2045_v25 = vsel %vm2044_vm14, %v3686_v10, %v2043_v22 }
 0x508   : > { %v1967_v33 = vmul.f32 %v1935_v12, %v1935_v12  ;;  %v2198_v2 = vrot.slane %v1935_v12, %v3030_v63  ;;  %v1951_v43 = vmul.f32 %v2731_v51, %v1903_v17  ;;  %v2737_v45 = vpop.eup %2736  ;;  %v3766_v1 = vmax.f32 %v1981_v34, 0.0001 }
 0x509   : > { %2744 = vrsqrt.f32 %v3756_v46  ;;  %v2739_v40 = vpop.eup %2738  ;;  %v2041_v8 = vsel %vm2039_vm6, %v2040_v38, %v2038_v44  ;;  %v2047_v5 = vand.u32 2147483648, %v3686_v10  ;;  %v2052_v61 = vsel %vm2051_vm5, %v3693_v13, %v2050_v9 }
 0x50a   : > { %v2199_v14 = vsel %vm549_vm2, %v2198_v2, %v2194_v42  ;;  %v1983_v36 = vsub.f32 %v1951_v43, %v1967_v33  ;;  %vm3992_vm2 = vcmask 130048   ;;  %2746 = vrsqrt.f32 %v3766_v1  ;;  %v2741_v41 = vpop.eup %2740 }
 0x50b   : > { %v2206_v63 = vsel %vm3991_vm7, %v2199_v14, %v2205_v18  ;;  %v2057_v56 = vmul.f32 %v2735_v29, %v3698_v20  ;;  %v2071_v16 = vmul.f32 %v2737_v45, %v3703_v37  ;;  %v2064_v11 = vmul.f32 %v2739_v40, %v3707_v27 }
 0x50c   : > { %2208 = vst.msk [vmem:[%s3773_s5] sm:$0xff] %vm3992_vm2, %v2206_v63  ;;  %v3779_v31 = vmax.f32 %v1983_v36, 0.0001  ;;  %v2249_v38 = vrot.slane %v2034_v24, %v3635_v55  ;;  %v2048_v50 = vsel %vm2046_vm0, %v2047_v5, %v2045_v25  ;;  %v2253_v48 = vrot.slane %v2041_v8, %v3628_v53 }
 0x50d   : > { %v2055_v10 = vsel %vm2053_vm1, %v2054_v62, %v2052_v61  ;;  %v2078_v19 = vmul.f32 %v2741_v41, %v3713_v35  ;;  %v2059_v52 = vsel %vm2058_vm3, %v3698_v20, %v2057_v56  ;;  %v2061_v47 = vand.u32 2147483648, %v3698_v20 }
 0x50e   : > { %2748 = vrsqrt.f32 %v3779_v31  ;;  %vm2065_vm12 = vcmp.eq.f32.partialorder %v3707_v27, inf  ;;  %v2073_v57 = vsel %vm2072_vm11, %v3703_v37, %v2071_v16  ;;  %vm2074_vm9 = vcmp.eq.f32.partialorder %v3703_v37, 0.0 }
 0x50f   : > { %v2075_v13 = vand.u32 2147483648, %v3703_v37  ;;  %v2066_v59 = vsel %vm2065_vm12, %v3707_v27, %v2064_v11  ;;  %v2254_v60 = vsel %vm2235_vm4, %v2253_v48, %v2249_v38  ;;  %v2262_v4 = vrot.slane %v2055_v10, %v3628_v53 }
 0x510   : > { %v2080_v51 = vsel %vm2079_vm13, %v3713_v35, %v2078_v19  ;;  %v2062_v37 = vsel %vm2060_vm10, %v2061_v47, %v2059_v52  ;;  %v2082_v32 = vand.u32 2147483648, %v3713_v35  ;;  %v2069_v58 = vsel %vm2067_vm8, %v2068_v15, %v2066_v59 }
 0x511   : > { %v2076_v3 = vsel %vm2074_vm9, %v2075_v13, %v2073_v57  ;;  %v2258_v7 = vrot.slane %v2048_v50, %v3635_v55  ;;  %vm2081_vm15 = vcmp.eq.f32.partialorder %v3713_v35, 0.0  ;;  %vm3993_vm7 = vcmask 1042434  }
 0x512   : > { %v2743_v39 = vpop.eup %2742  ;;  %v2301_v12 = vsel %vm3993_vm7, %v2254_v60, %v3645_v26  ;;  %vm2086_vm14 = vcmp.eq.f32.partialorder %v3740_v30, inf  ;;  %v2083_v27 = vsel %vm2081_vm15, %v2082_v32, %v2080_v51  ;;  %v2267_v20 = vrot.slane %v2062_v37, %v3635_v55 }
 0x513   : > { %v2085_v6 = vmul.f32 %v2743_v39, %v3740_v30  ;;  %v2263_v54 = vsel %vm2235_vm4, %v2262_v4, %v2258_v7  ;;  %v2271_v0 = vrot.slane %v2069_v58, %v3628_v53  ;;  %v2276_v17 = vrot.slane %v2076_v3, %v3635_v55 }
 0x514   : > { %v2089_v23 = vand.u32 2147483648, %v3740_v30  ;;  %vm2088_vm6 = vcmp.eq.f32.partialorder %v3740_v30, 0.0  ;;  %vm2100_vm5 = vcmp.eq.f32.partialorder %v3756_v46, inf  ;;  %vm2102_vm2 = vcmp.eq.f32.partialorder %v3756_v46, 0.0 }
 0x515   : > { %v2087_v22 = vsel %vm2086_vm14, %v3740_v30, %v2085_v6  ;;  %v2103_v33 = vand.u32 2147483648, %v3756_v46  ;;  %v2280_v2 = vrot.slane %v2083_v27, %v3628_v53  ;;  %vm2093_vm0 = vcmp.eq.f32.partialorder %v3766_v1, inf }
 0x516   : > { %v2745_v21 = vpop.eup %2744  ;;  %v2096_v34 = vand.u32 2147483648, %v3766_v1  ;;  %v2090_v43 = vsel %vm2088_vm6, %v2089_v23, %v2087_v22  ;;  %vm2095_vm1 = vcmp.eq.f32.partialorder %v3766_v1, 0.0  ;;  %vm2107_vm3 = vcmp.eq.f32.partialorder %v3779_v31, inf }
 0x517   : > { %v2099_v28 = vmul.f32 %v2745_v21, %v3756_v46  ;;  %v2747_v35 = vpop.eup %2746  ;;  %vm2109_vm10 = vcmp.eq.f32.partialorder %v3779_v31, 0.0  ;;  %v2110_v18 = vand.u32 2147483648, %v3779_v31  ;;  %v2281_v45 = vsel %vm2235_vm4, %v2280_v2, %v2276_v17 }
 0x518   : > { %v2092_v26 = vmul.f32 %v2747_v35, %v3766_v1  ;;  %v2285_v63 = vrot.slane %v2090_v43, %v3635_v55  ;;  %vm3994_vm11 = vcmask 1043459   ;;  %vm3995_vm12 = vcmask 1044484  }
 0x519   : > { %v2101_v42 = vsel %vm2100_vm5, %v3756_v46, %v2099_v28  ;;  %v2272_v46 = vsel %vm2235_vm4, %v2271_v0, %v2267_v20  ;;  %v2302_v40 = vsel %vm3994_vm11, %v2263_v54, %v2301_v12  ;;  %vm3996_vm9 = vcmask 1045509  }
 0x51a   : > { %v2094_v29 = vsel %vm2093_vm0, %v3766_v1, %v2092_v26  ;;  %v2104_v9 = vsel %vm2102_vm2, %v2103_v33, %v2101_v42  ;;  %vm2308_vm13 = vcmask 261248   ;;  %vm3997_vm8 = vcmask 1046534  }
 0x51b   : > { %v2749_v49 = vpop.eup %2748  ;;  %v2097_v44 = vsel %vm2095_vm1, %v2096_v34, %v2094_v29  ;;  %v2294_v25 = vrot.slane %v2104_v9, %v3635_v55  ;;  %vm3998_vm15 = vcmask 1047559  }
 0x51c   : > { %v2106_v30 = vmul.f32 %v2749_v49, %v3779_v31  ;;  %v2289_v36 = vrot.slane %v2097_v44, %v3628_v53 }
 0x51e   : > { %v2108_v14 = vsel %vm2107_vm3, %v3779_v31, %v2106_v30  ;;  %v2290_v24 = vsel %vm2235_vm4, %v2289_v36, %v2285_v63  ;;  %v2303_v31 = vsel %vm3995_vm12, %v2272_v46, %v2302_v40 }
 0x51f   : > { %v2111_v1 = vsel %vm2109_vm10, %v2110_v18, %v2108_v14  ;;  %v2304_v41 = vsel %vm3996_vm9, %v2281_v45, %v2303_v31 }
 0x520   : > { %v2298_v8 = vrot.slane %v2111_v1, %v3628_v53  ;;  %v2305_v61 = vsel %vm3997_vm8, %v2290_v24, %v2304_v41 }
 0x522   : > { %v2299_v5 = vsel %vm2235_vm4, %v2298_v8, %v2294_v25 }
 0x523   : > { %v2306_v56 = vsel %vm3998_vm15, %v2299_v5, %v2305_v61 }
 0x524   : > { %2309 = vst.msk [vmem:[%s3773_s5] sm:$0xff] %vm2308_vm13, %v2306_v56 }
 0x525   : > { %2779 = shalt.err (!%p2776_p3)
}
 0x526   : > { %s2780_s20 = scalar_lea.hbm %s3858_s19, 128  ;;  %s2784_s27 = scalar_lea.hbm %s3901_s4, 256 }
 0x527   : > { %p2781_p4 = scmp.ne.s32.totalorder %s3858_s19, %s2780_s20  ;;  %p2785_p9 = scmp.lt.s32.totalorder %s3858_s19, %s3901_s4 }
 0x528   : > { %p2786_p10 = scmp.lt.s32.totalorder %s2784_s27, %s2780_s20 }
 0x529   : > { %p2782_p7 = pnand %p2781_p4, %p2894_p5 }
 0x52a   : > { %p2787_p11 = por %p2786_p10, %p2785_p9 }
 0x52b   : > { %p2783_p8 = pneg %p2782_p7 }
 0x52d   : > { %p2788_p12 = pnand %p2787_p11, %p2783_p8 }
 0x52f   : > { %2791 = shalt.err (!%p2788_p12)
}
 0x530   : > { %2564 = dma.vmem_to_hbm [thread:$0]  (%p2894_p5), %s2325_s7, 128, %s3858_s19, %s2311_s10  }
 0x531 PF: > { %p2570_p13 = scmp.ge.s32.totalorder %s2826_s18, 2  ;;  %s2336_s30 = sand.u32 1, %s2814_s15  }
 0x532   : > { %s2337_s5 = scalar_lea.sflag [#allocation3], %s2336_s30 }
 0x533   : > { %p2567_p0 = pnand %p2570_p13, %p2898_p6 }
 0x535   : > { %p2568_p1 = pneg %p2567_p0 }
 0x537   : > { %2809 = dma.done.wait (%p2568_p1), %s2337_s5, 128  }
 0x538   : > { %2811 = vsyncadd (%p2568_p1), %s2337_s5, 4294967168  ;;  %p14_p2 = scmp.ge.s32.totalorder %s2881_s21, 4   ;;  %s3999_s15 = smov %s2818_s16 }
 0x539   : > { %s4000_s16 = smov %s2822_s17  ;;  %s4001_s17 = smov %s2892_s24 }
 0x53a   : > { %s4002_s18 = smov %s2881_s21  ;;  %16 = sbr.rel (!%p14_p2) target bundleno = 3 (0x3), region = 71 }
 0x53f   :  { %2342 = vsyncpa [#allocation3], 1 }
 0x540   :  { %2344 = vsyncpa [#allocation3 + $0x1], 1 }

</bundles_post_ra>
